<compile_context>
chip_gen: v7x
topology: tpu7x:2x2x1
jax: 0.10.0
libtpu: 0.0.40
codegen_flags: <defaults>
</compile_context>

<pallas_src>
from functools import partial

import jax
import jax.numpy as jnp
from jax import lax
from jax.experimental import pallas as pl
from jax.experimental.pallas import tpu as pltpu


def _round_up(x, m):
    return (x + m - 1) // m * m


def _pick_row_tile(hp, target):
    t = max(1, min(int(hp), int(target)))
    while hp % t:
        t -= 1
    return t


def _tile_bytes(shape, itemsize):
    """VMEM footprint of a block, accounting for (8, 128) tile padding."""
    lead = 1
    for d in shape[:-2]:
        lead *= int(d)
    return lead * _round_up(int(shape[-2]), 8) * _round_up(int(shape[-1]), 128) * itemsize


def _vmem_limit_bytes(block_bytes, scratch_bytes):
    need = 2 * block_bytes + scratch_bytes          # double-buffered blocks + scratch
    try:
        phys = int(pltpu.get_tpu_info().vmem_capacity_bytes)
    except Exception:  # pragma: no cover - conservative default (v7x per-core VMEM)
        phys = 64 * 1024 * 1024
    return int(min(int(phys * 0.9), max(32 * 1024 * 1024, 2 * need)))


def _down_kernel(x_ref, w1_ref, s1_ref, b1_ref, w2_ref, s2_ref, b2_ref,
                 o_ref, pad1, pad2, *, wq, base1):
    # x_ref : (1, 2, 2*Hp+8, Wq, Cin) bf16  -- even/odd-W slabs, zero padded:
    #          4 zero rows top/bottom, data columns 1..Wp, zero columns elsewhere
    # w*_ref: (9, C_in_tap, C_out_tap) bf16 -- one (Cin, Cout) matrix per 3x3 tap
    # s*, b*: (1, C) f32                    -- folded BatchNorm scale / shift
    # o_ref : (1, TR, Wp, Cout) bf16
    # pad1  : VMEM (base1 + (TR+4)*Wq + 8, Cin)  bf16  flat zero-halo pooled band
    # pad2  : VMEM ((TR+2)*Wq + 8, Cmid)         bf16  flat zero-halo conv1 band
    TR, Wp, Cout = o_ref.shape[1], o_ref.shape[2], o_ref.shape[3]
    Cin, Cmid = w1_ref.shape[1], w1_ref.shape[2]
    Wq = wq
    r = pl.program_id(1)
    nb = pl.num_programs(1)

    # ---- 2x2 MaxPool: TR+4 pooled rows (incl. the 2-row vertical halo) ----
    row0 = r * (2 * TR)
    n_in = 2 * (TR + 4)
    xe = x_ref[0, 0, pl.ds(row0, n_in), :, :]            # even W columns
    xo = x_ref[0, 1, pl.ds(row0, n_in), :, :]            # odd  W columns
    wmax = jnp.maximum(xe, xo)                           # (n_in, Wq, Cin)
    wmax = wmax.reshape(TR + 4, 2, Wq, Cin)              # leading-dim split (free)
    pooled = jnp.maximum(wmax[:, 0], wmax[:, 1])         # (TR+4, Wq, Cin)
    # `pooled` already carries the zero L/R halo columns baked in by the wrapper.
    pad1[base1:base1 + (TR + 4) * Wq, :] = pooled.reshape((TR + 4) * Wq, Cin)

    # ---- Conv1 (3x3, pad=1) + BN + ReLU: 9 accumulating MXU matmuls ----
    # Computed on the padded width Wq for TR+2 rows (one halo row per side for
    # conv2).  Valid data lands in columns 1..Wp; the junk columns are zeroed by
    # jnp.where below, which doubles as conv2's zero W-padding.
    L1 = (TR + 2) * Wq
    acc1 = jnp.zeros((L1, Cmid), jnp.float32)
    for ky in range(3):
        for kx in range(3):
            s = base1 + ky * Wq + kx - 1
            acc1 = acc1 + jnp.dot(pad1[s:s + L1, :], w1_ref[3 * ky + kx],
                                  preferred_element_type=jnp.float32)
    h1 = jnp.maximum(acc1 * s1_ref[...] + b1_ref[...], 0.0)
    h1 = h1.reshape(TR + 2, Wq, Cmid)
    col = lax.broadcasted_iota(jnp.int32, (1, Wq, 1), 1)
    h1 = jnp.where((col >= 1) & (col <= Wp), h1, 0.0)    # exact zeros (kills junk/NaN)
    pad2[0:(TR + 2) * Wq, :] = h1.astype(pad2.dtype).reshape((TR + 2) * Wq, Cmid)

    # Global top/bottom zero padding of conv2's input (first / last band only).
    @pl.when(r == 0)
    def _():
        pad2[0:Wq, :] = jnp.zeros((Wq, Cmid), pad2.dtype)

    @pl.when(r == nb - 1)
    def _():
        pad2[(TR + 1) * Wq:(TR + 2) * Wq, :] = jnp.zeros((Wq, Cmid), pad2.dtype)

    # ---- Conv2 (3x3, pad=1) + BN + ReLU ----
    L2 = TR * Wq
    acc2 = jnp.zeros((L2, Cout), jnp.float32)
    for ky in range(3):
        for kx in range(3):
            s = ky * Wq + kx
            acc2 = acc2 + jnp.dot(pad2[s:s + L2, :], w2_ref[3 * ky + kx],
                                  preferred_element_type=jnp.float32)
    y = jnp.maximum(acc2 * s2_ref[...] + b2_ref[...], 0.0)
    y = y.reshape(TR, Wq, Cout)[:, :Wp, :]               # crop the junk columns
    o_ref[0] = y.astype(o_ref.dtype)


@partial(jax.jit, static_argnames=("row_tile",))
def down_pallas(x_nchw, w1, s1, b1, w2, s2, b2, row_tile=32):
    B, Cin, H, W = x_nchw.shape
    Hp, Wp = H // 2, W // 2
    Cmid, Cout = int(w1.shape[2]), int(w2.shape[2])
    TR = _pick_row_tile(Hp, row_tile)
    nb = Hp // TR
    Wq = _round_up(Wp + 2, 8)
    BASE1 = 8

    # PyTorch MaxPool2d(2) floors odd spatial dims: crop first.
    x = x_nchw[:, :, :2 * Hp, :2 * Wp]

    # Single HBM rearrangement: NCHW -> (B, 2, 2*Hp+8, Wq, Cin) bf16, channels
    # minor, even/odd W columns split on axis 1, 4-row vertical halo and the
    # conv W zero-padding (data columns 1..Wp) pre-baked.
    xw = x.reshape(B, Cin, 2 * Hp, Wp, 2)
    xw = jnp.transpose(xw, (0, 4, 2, 3, 1))                       # (B, 2, 2Hp, Wp, Cin)
    xw = jnp.pad(xw, ((0, 0), (0, 0), (4, 4), (1, Wq - Wp - 1), (0, 0)))
    xw = xw.astype(jnp.bfloat16)

    w1b = w1.astype(jnp.bfloat16)                                 # (9, Cin, Cmid)
    w2b = w2.astype(jnp.bfloat16)                                 # (9, Cmid, Cout)

    pad1_rows = BASE1 + (TR + 4) * Wq + 8
    pad2_rows = (TR + 2) * Wq + 8

    block_bytes = (_tile_bytes((1, 2, 2 * Hp + 8, Wq, Cin), 2)
                   + _tile_bytes((1, TR, Wp, Cout), 2)
                   + _tile_bytes((9, Cin, Cmid), 2) + _tile_bytes((9, Cmid, Cout), 2)
                   + 2 * _tile_bytes((1, Cmid), 4) + 2 * _tile_bytes((1, Cout), 4))
    scratch_bytes = (_tile_bytes((pad1_rows, Cin), 2)
                     + _tile_bytes((pad2_rows, Cmid), 2)
                     + _tile_bytes(((TR + 2) * Wq, Cmid), 4)      # conv1 accumulator
                     + _tile_bytes((TR * Wq, Cout), 4)            # conv2 accumulator
                     + _tile_bytes(((TR + 4) * Wq, Cin), 4))      # pooling temporaries
    vmem_limit = _vmem_limit_bytes(block_bytes, scratch_bytes)

    flops = 2 * B * Hp * Wp * 9 * (Cin * Cmid + Cmid * Cout)
    bytes_accessed = (B * 2 * (2 * Hp + 8) * Wq * Cin * 2
                      + (9 * Cin * Cmid + 9 * Cmid * Cout) * 2
                      + (2 * Cmid + 2 * Cout) * 4
                      + B * Hp * Wp * Cout * 2)

    out_nhwc = pl.pallas_call(
        partial(_down_kernel, wq=Wq, base1=BASE1),
        out_shape=jax.ShapeDtypeStruct((B, Hp, Wp, Cout), jnp.bfloat16),
        grid=(B, nb),
        in_specs=[
            pl.BlockSpec((1, 2, 2 * Hp + 8, Wq, Cin), lambda b, r: (b, 0, 0, 0, 0)),
            pl.BlockSpec((9, Cin, Cmid), lambda b, r: (0, 0, 0)),
            pl.BlockSpec((1, Cmid), lambda b, r: (0, 0)),
            pl.BlockSpec((1, Cmid), lambda b, r: (0, 0)),
            pl.BlockSpec((9, Cmid, Cout), lambda b, r: (0, 0, 0)),
            pl.BlockSpec((1, Cout), lambda b, r: (0, 0)),
            pl.BlockSpec((1, Cout), lambda b, r: (0, 0)),
        ],
        out_specs=pl.BlockSpec((1, TR, Wp, Cout), lambda b, r: (b, r, 0, 0)),
        scratch_shapes=[
            pltpu.VMEM((pad1_rows, Cin), jnp.bfloat16),
            pltpu.VMEM((pad2_rows, Cmid), jnp.bfloat16),
        ],
        compiler_params=pltpu.CompilerParams(
            dimension_semantics=("parallel", "parallel"),
            vmem_limit_bytes=vmem_limit),
        cost_estimate=pl.CostEstimate(
            flops=flops, transcendentals=0, bytes_accessed=bytes_accessed),
    )(xw, w1b, s1, b1, w2b, s2, b2)

    # NHWC bf16 -> NCHW f32 only to match the PyTorch module's convention; drop
    # this if the consumer accepts NHWC bf16.
    return jnp.transpose(out_nhwc, (0, 3, 1, 2)).astype(jnp.float32)


def _reference(x_nchw, w1, s1, b1, w2, s2, b2):
    """Pure-JAX reference emulating the kernel's bf16 quantization points."""
    bf = lambda t: t.astype(jnp.bfloat16).astype(jnp.float32)
    Cin, Cmid = w1.shape[1], w1.shape[2]
    Cout = w2.shape[2]
    x = bf(jnp.transpose(x_nchw, (0, 2, 3, 1)))
    pooled = lax.reduce_window(x, -jnp.inf, lax.max,
                               (1, 2, 2, 1), (1, 2, 2, 1), "VALID")
    k1 = bf(w1).reshape(3, 3, Cin, Cmid)
    y = lax.conv_general_dilated(pooled, k1, (1, 1), "SAME",
                                 dimension_numbers=("NHWC", "HWIO", "NHWC"),
                                 precision=lax.Precision.HIGHEST)
    y = jnp.maximum(y * s1 + b1, 0.0)
    y = bf(y)
    k2 = bf(w2).reshape(3, 3, Cmid, Cout)
    y = lax.conv_general_dilated(y, k2, (1, 1), "SAME",
                                 dimension_numbers=("NHWC", "HWIO", "NHWC"),
                                 precision=lax.Precision.HIGHEST)
    y = jnp.maximum(y * s2 + b2, 0.0)
    y = bf(y)
    return jnp.transpose(y, (0, 3, 1, 2))


def _make_params(key, cin, cmid, cout, eps=1e-5):
    ks = jax.random.split(key, 10)
    w1 = 0.1 * jax.random.normal(ks[0], (9, cin, cmid), jnp.float32)
    w2 = 0.1 * jax.random.normal(ks[1], (9, cmid, cout), jnp.float32)

    def bn(kg, kb, km, kv, c):
        gamma = 1.0 + 0.1 * jax.random.normal(kg, (c,), jnp.float32)
        beta = 0.1 * jax.random.normal(kb, (c,), jnp.float32)
        mean = 0.1 * jax.random.normal(km, (c,), jnp.float32)
        var = 1.0 + 0.2 * jnp.abs(jax.random.normal(kv, (c,), jnp.float32))
        scale = gamma / jnp.sqrt(var + eps)
        shift = beta - mean * scale
        return scale.reshape(1, c), shift.reshape(1, c)

    s1, b1 = bn(ks[2], ks[3], ks[4], ks[5], cmid)
    s2, b2 = bn(ks[6], ks[7], ks[8], ks[9], cout)
    return w1, s1, b1, w2, s2, b2


if __name__ == "__main__":
    B, Cin, H, W = 2, 4, 16, 16
    Cout = 8                      # DoubleConv: mid_channels == out_channels
    Cmid = Cout

    key = jax.random.PRNGKey(0)
    kx, kp = jax.random.split(key)
    x = jax.random.normal(kx, (B, Cin, H, W), jnp.float32)
    params = _make_params(kp, Cin, Cmid, Cout)

    ref = _reference(x, *params)

    # Multi-band run (row_tile=4 -> 2 row bands): exercises the halo handling.
    out = jax.block_until_ready(down_pallas(x, *params, row_tile=4))
    assert out.shape == (B, Cout, H // 2, W // 2), out.shape
    assert jnp.allclose(out, ref, atol=2e-2, rtol=2e-2), float(
        jnp.max(jnp.abs(out - ref)))

    # Single-band run (default row_tile): whole image per grid step.
    out1 = jax.block_until_ready(down_pallas(x, *params))
    assert jnp.allclose(out1, ref, atol=2e-2, rtol=2e-2), float(
        jnp.max(jnp.abs(out1 - ref)))

    print("KERNEL_OK")
</pallas_src>

<mosaic_0001>
module attributes {stable_mosaic.version = 11 : i64} {
  func.func @_down_kernel(%arg0: i32, %arg1: i32, %arg2: memref<1x2x24x16x4xbf16, #tpu.memory_space<vmem>>, %arg3: memref<9x4x8xbf16, #tpu.memory_space<vmem>>, %arg4: memref<1x8xf32, #tpu.memory_space<vmem>>, %arg5: memref<1x8xf32, #tpu.memory_space<vmem>>, %arg6: memref<9x8x8xbf16, #tpu.memory_space<vmem>>, %arg7: memref<1x8xf32, #tpu.memory_space<vmem>>, %arg8: memref<1x8xf32, #tpu.memory_space<vmem>>, %arg9: memref<1x4x8x8xbf16, #tpu.memory_space<vmem>>, %arg10: memref<144x4xbf16, #tpu.memory_space<vmem>>, %arg11: memref<104x8xbf16, #tpu.memory_space<vmem>>) attributes {dimension_semantics = [#tpu.dimension_semantics<parallel>, #tpu.dimension_semantics<parallel>], iteration_bounds = array<i64: 2, 2>, scalar_prefetch = 0 : i64, scratch_operands = 2 : i64, tpu.core_type = #tpu.core_type<tc>, window_params = [{transform_indices = @transform_0, window_bounds = array<i64: 1, 2, 24, 16, 4>}, {pipeline_mode = #tpu.pipeline_mode<synchronous>, transform_indices = @transform_1, window_bounds = array<i64: 9, 4, 8>}, {pipeline_mode = #tpu.pipeline_mode<synchronous>, transform_indices = @transform_2, window_bounds = array<i64: 1, 8>}, {pipeline_mode = #tpu.pipeline_mode<synchronous>, transform_indices = @transform_3, window_bounds = array<i64: 1, 8>}, {pipeline_mode = #tpu.pipeline_mode<synchronous>, transform_indices = @transform_4, window_bounds = array<i64: 9, 8, 8>}, {pipeline_mode = #tpu.pipeline_mode<synchronous>, transform_indices = @transform_5, window_bounds = array<i64: 1, 8>}, {pipeline_mode = #tpu.pipeline_mode<synchronous>, transform_indices = @transform_6, window_bounds = array<i64: 1, 8>}, {transform_indices = @transform_7, window_bounds = array<i64: 1, 4, 8, 8>}]} {
    %c8_i32 = arith.constant 8 : i32
    %0 = arith.muli %arg1, %c8_i32 : i32
    %c0 = arith.constant 0 : index
    %c0_0 = arith.constant 0 : index
    %1 = arith.index_cast %0 : i32 to index
    %c0_1 = arith.constant 0 : index
    %c0_2 = arith.constant 0 : index
    %2 = vector.load %arg2[%c0, %c0_0, %1, %c0_1, %c0_2] : memref<1x2x24x16x4xbf16, #tpu.memory_space<vmem>>, vector<1x1x16x16x4xbf16>
    %3 = vector.shape_cast %2 : vector<1x1x16x16x4xbf16> to vector<16x16x4xbf16>
    %c0_3 = arith.constant 0 : index
    %c1 = arith.constant 1 : index
    %4 = arith.index_cast %0 : i32 to index
    %c0_4 = arith.constant 0 : index
    %c0_5 = arith.constant 0 : index
    %5 = vector.load %arg2[%c0_3, %c1, %4, %c0_4, %c0_5] : memref<1x2x24x16x4xbf16, #tpu.memory_space<vmem>>, vector<1x1x16x16x4xbf16>
    %6 = vector.shape_cast %5 : vector<1x1x16x16x4xbf16> to vector<16x16x4xbf16>
    %7 = arith.maximumf %3, %6 : vector<16x16x4xbf16>
    %8 = vector.shape_cast %7 : vector<16x16x4xbf16> to vector<8x2x16x4xbf16>
    %9 = vector.extract_strided_slice %8 {offsets = [0, 0, 0, 0], sizes = [8, 1, 16, 4], strides = [1, 1, 1, 1]} : vector<8x2x16x4xbf16> to vector<8x1x16x4xbf16>
    %10 = vector.shape_cast %9 : vector<8x1x16x4xbf16> to vector<8x16x4xbf16>
    %11 = vector.extract_strided_slice %8 {offsets = [0, 1, 0, 0], sizes = [8, 1, 16, 4], strides = [1, 1, 1, 1]} : vector<8x2x16x4xbf16> to vector<8x1x16x4xbf16>
    %12 = vector.shape_cast %11 : vector<8x1x16x4xbf16> to vector<8x16x4xbf16>
    %13 = arith.maximumf %10, %12 : vector<8x16x4xbf16>
    %14 = vector.shape_cast %13 : vector<8x16x4xbf16> to vector<128x4xbf16>
    %c8 = arith.constant 8 : index
    %c0_6 = arith.constant 0 : index
    %15 = vector.load %arg10[%c8, %c0_6] : memref<144x4xbf16, #tpu.memory_space<vmem>>, vector<128x4xbf16>
    tpu.vector_store %arg10[%c8, %c0_6], %14 {strides = array<i32>} : memref<144x4xbf16, #tpu.memory_space<vmem>>, vector<128x4xbf16>,
    %cst = arith.constant 0.000000e+00 : f32
    %16 = vector.broadcast %cst : f32 to vector<96x8xf32>
    %c7 = arith.constant 7 : index
    %c0_7 = arith.constant 0 : index
    %17 = vector.load %arg10[%c7, %c0_7] : memref<144x4xbf16, #tpu.memory_space<vmem>>, vector<96x4xbf16>
    %c0_8 = arith.constant 0 : index
    %c0_9 = arith.constant 0 : index
    %c0_10 = arith.constant 0 : index
    %18 = vector.load %arg3[%c0_8, %c0_9, %c0_10] : memref<9x4x8xbf16, #tpu.memory_space<vmem>>, vector<1x4x8xbf16>
    %19 = vector.shape_cast %18 : vector<1x4x8xbf16> to vector<4x8xbf16>
    %cst_11 = arith.constant dense<0.000000e+00> : vector<96x8xf32>
    %20 = tpu.matmul %17, %19, %cst_11 {dimension_numbers = #tpu.dot_dimension_numbers<[1], [0], [0], [1], [0, 0, 1, 1], [], []>} : vector<96x4xbf16>, vector<4x8xbf16>, vector<96x8xf32> -> vector<96x8xf32>
    %21 = arith.addf %16, %20 : vector<96x8xf32>
    %c8_12 = arith.constant 8 : index
    %c0_13 = arith.constant 0 : index
    %22 = vector.load %arg10[%c8_12, %c0_13] : memref<144x4xbf16, #tpu.memory_space<vmem>>, vector<96x4xbf16>
    %c1_14 = arith.constant 1 : index
    %c0_15 = arith.constant 0 : index
    %c0_16 = arith.constant 0 : index
    %23 = vector.load %arg3[%c1_14, %c0_15, %c0_16] : memref<9x4x8xbf16, #tpu.memory_space<vmem>>, vector<1x4x8xbf16>
    %24 = vector.shape_cast %23 : vector<1x4x8xbf16> to vector<4x8xbf16>
    %cst_17 = arith.constant dense<0.000000e+00> : vector<96x8xf32>
    %25 = tpu.matmul %22, %24, %cst_17 {dimension_numbers = #tpu.dot_dimension_numbers<[1], [0], [0], [1], [0, 0, 1, 1], [], []>} : vector<96x4xbf16>, vector<4x8xbf16>, vector<96x8xf32> -> vector<96x8xf32>
    %26 = arith.addf %21, %25 : vector<96x8xf32>
    %c9 = arith.constant 9 : index
    %c0_18 = arith.constant 0 : index
    %27 = vector.load %arg10[%c9, %c0_18] : memref<144x4xbf16, #tpu.memory_space<vmem>>, vector<96x4xbf16>
    %c2 = arith.constant 2 : index
    %c0_19 = arith.constant 0 : index
    %c0_20 = arith.constant 0 : index
    %28 = vector.load %arg3[%c2, %c0_19, %c0_20] : memref<9x4x8xbf16, #tpu.memory_space<vmem>>, vector<1x4x8xbf16>
    %29 = vector.shape_cast %28 : vector<1x4x8xbf16> to vector<4x8xbf16>
    %cst_21 = arith.constant dense<0.000000e+00> : vector<96x8xf32>
    %30 = tpu.matmul %27, %29, %cst_21 {dimension_numbers = #tpu.dot_dimension_numbers<[1], [0], [0], [1], [0, 0, 1, 1], [], []>} : vector<96x4xbf16>, vector<4x8xbf16>, vector<96x8xf32> -> vector<96x8xf32>
    %31 = arith.addf %26, %30 : vector<96x8xf32>
    %c23 = arith.constant 23 : index
    %c0_22 = arith.constant 0 : index
    %32 = vector.load %arg10[%c23, %c0_22] : memref<144x4xbf16, #tpu.memory_space<vmem>>, vector<96x4xbf16>
    %c3 = arith.constant 3 : index
    %c0_23 = arith.constant 0 : index
    %c0_24 = arith.constant 0 : index
    %33 = vector.load %arg3[%c3, %c0_23, %c0_24] : memref<9x4x8xbf16, #tpu.memory_space<vmem>>, vector<1x4x8xbf16>
    %34 = vector.shape_cast %33 : vector<1x4x8xbf16> to vector<4x8xbf16>
    %cst_25 = arith.constant dense<0.000000e+00> : vector<96x8xf32>
    %35 = tpu.matmul %32, %34, %cst_25 {dimension_numbers = #tpu.dot_dimension_numbers<[1], [0], [0], [1], [0, 0, 1, 1], [], []>} : vector<96x4xbf16>, vector<4x8xbf16>, vector<96x8xf32> -> vector<96x8xf32>
    %36 = arith.addf %31, %35 : vector<96x8xf32>
    %c24 = arith.constant 24 : index
    %c0_26 = arith.constant 0 : index
    %37 = vector.load %arg10[%c24, %c0_26] : memref<144x4xbf16, #tpu.memory_space<vmem>>, vector<96x4xbf16>
    %c4 = arith.constant 4 : index
    %c0_27 = arith.constant 0 : index
    %c0_28 = arith.constant 0 : index
    %38 = vector.load %arg3[%c4, %c0_27, %c0_28] : memref<9x4x8xbf16, #tpu.memory_space<vmem>>, vector<1x4x8xbf16>
    %39 = vector.shape_cast %38 : vector<1x4x8xbf16> to vector<4x8xbf16>
    %cst_29 = arith.constant dense<0.000000e+00> : vector<96x8xf32>
    %40 = tpu.matmul %37, %39, %cst_29 {dimension_numbers = #tpu.dot_dimension_numbers<[1], [0], [0], [1], [0, 0, 1, 1], [], []>} : vector<96x4xbf16>, vector<4x8xbf16>, vector<96x8xf32> -> vector<96x8xf32>
    %41 = arith.addf %36, %40 : vector<96x8xf32>
    %c25 = arith.constant 25 : index
    %c0_30 = arith.constant 0 : index
    %42 = vector.load %arg10[%c25, %c0_30] : memref<144x4xbf16, #tpu.memory_space<vmem>>, vector<96x4xbf16>
    %c5 = arith.constant 5 : index
    %c0_31 = arith.constant 0 : index
    %c0_32 = arith.constant 0 : index
    %43 = vector.load %arg3[%c5, %c0_31, %c0_32] : memref<9x4x8xbf16, #tpu.memory_space<vmem>>, vector<1x4x8xbf16>
    %44 = vector.shape_cast %43 : vector<1x4x8xbf16> to vector<4x8xbf16>
    %cst_33 = arith.constant dense<0.000000e+00> : vector<96x8xf32>
    %45 = tpu.matmul %42, %44, %cst_33 {dimension_numbers = #tpu.dot_dimension_numbers<[1], [0], [0], [1], [0, 0, 1, 1], [], []>} : vector<96x4xbf16>, vector<4x8xbf16>, vector<96x8xf32> -> vector<96x8xf32>
    %46 = arith.addf %41, %45 : vector<96x8xf32>
    %c39 = arith.constant 39 : index
    %c0_34 = arith.constant 0 : index
    %47 = vector.load %arg10[%c39, %c0_34] : memref<144x4xbf16, #tpu.memory_space<vmem>>, vector<96x4xbf16>
    %c6 = arith.constant 6 : index
    %c0_35 = arith.constant 0 : index
    %c0_36 = arith.constant 0 : index
    %48 = vector.load %arg3[%c6, %c0_35, %c0_36] : memref<9x4x8xbf16, #tpu.memory_space<vmem>>, vector<1x4x8xbf16>
    %49 = vector.shape_cast %48 : vector<1x4x8xbf16> to vector<4x8xbf16>
    %cst_37 = arith.constant dense<0.000000e+00> : vector<96x8xf32>
    %50 = tpu.matmul %47, %49, %cst_37 {dimension_numbers = #tpu.dot_dimension_numbers<[1], [0], [0], [1], [0, 0, 1, 1], [], []>} : vector<96x4xbf16>, vector<4x8xbf16>, vector<96x8xf32> -> vector<96x8xf32>
    %51 = arith.addf %46, %50 : vector<96x8xf32>
    %c40 = arith.constant 40 : index
    %c0_38 = arith.constant 0 : index
    %52 = vector.load %arg10[%c40, %c0_38] : memref<144x4xbf16, #tpu.memory_space<vmem>>, vector<96x4xbf16>
    %c7_39 = arith.constant 7 : index
    %c0_40 = arith.constant 0 : index
    %c0_41 = arith.constant 0 : index
    %53 = vector.load %arg3[%c7_39, %c0_40, %c0_41] : memref<9x4x8xbf16, #tpu.memory_space<vmem>>, vector<1x4x8xbf16>
    %54 = vector.shape_cast %53 : vector<1x4x8xbf16> to vector<4x8xbf16>
    %cst_42 = arith.constant dense<0.000000e+00> : vector<96x8xf32>
    %55 = tpu.matmul %52, %54, %cst_42 {dimension_numbers = #tpu.dot_dimension_numbers<[1], [0], [0], [1], [0, 0, 1, 1], [], []>} : vector<96x4xbf16>, vector<4x8xbf16>, vector<96x8xf32> -> vector<96x8xf32>
    %56 = arith.addf %51, %55 : vector<96x8xf32>
    %c41 = arith.constant 41 : index
    %c0_43 = arith.constant 0 : index
    %57 = vector.load %arg10[%c41, %c0_43] : memref<144x4xbf16, #tpu.memory_space<vmem>>, vector<96x4xbf16>
    %c8_44 = arith.constant 8 : index
    %c0_45 = arith.constant 0 : index
    %c0_46 = arith.constant 0 : index
    %58 = vector.load %arg3[%c8_44, %c0_45, %c0_46] : memref<9x4x8xbf16, #tpu.memory_space<vmem>>, vector<1x4x8xbf16>
    %59 = vector.shape_cast %58 : vector<1x4x8xbf16> to vector<4x8xbf16>
    %cst_47 = arith.constant dense<0.000000e+00> : vector<96x8xf32>
    %60 = tpu.matmul %57, %59, %cst_47 {dimension_numbers = #tpu.dot_dimension_numbers<[1], [0], [0], [1], [0, 0, 1, 1], [], []>} : vector<96x4xbf16>, vector<4x8xbf16>, vector<96x8xf32> -> vector<96x8xf32>
    %61 = arith.addf %56, %60 : vector<96x8xf32>
    %c0_48 = arith.constant 0 : index
    %c0_49 = arith.constant 0 : index
    %62 = vector.load %arg4[%c0_48, %c0_49] : memref<1x8xf32, #tpu.memory_space<vmem>>, vector<1x8xf32>
    %63 = vector.broadcast %62 : vector<1x8xf32> to vector<96x8xf32>
    %64 = arith.mulf %61, %63 : vector<96x8xf32>
    %c0_50 = arith.constant 0 : index
    %c0_51 = arith.constant 0 : index
    %65 = vector.load %arg5[%c0_50, %c0_51] : memref<1x8xf32, #tpu.memory_space<vmem>>, vector<1x8xf32>
    %66 = vector.broadcast %65 : vector<1x8xf32> to vector<96x8xf32>
    %67 = arith.addf %64, %66 : vector<96x8xf32>
    %cst_52 = arith.constant 0.000000e+00 : f32
    %68 = vector.broadcast %cst_52 : f32 to vector<96x8xf32>
    %69 = arith.maximumf %67, %68 : vector<96x8xf32>
    %70 = vector.shape_cast %69 : vector<96x8xf32> to vector<6x16x8xf32>
    %71 = tpu.iota {dimensions = array<i32: 1>} : vector<1x16x1xi32>
    %c1_i32 = arith.constant 1 : i32
    %72 = vector.broadcast %c1_i32 : i32 to vector<1x16x1xi32>
    %73 = arith.cmpi sge, %71, %72 : vector<1x16x1xi32>
    %c8_i32_53 = arith.constant 8 : i32
    %74 = vector.broadcast %c8_i32_53 : i32 to vector<1x16x1xi32>
    %75 = arith.cmpi sle, %71, %74 : vector<1x16x1xi32>
    %76 = arith.andi %73, %75 : vector<1x16x1xi1>
    %cst_54 = arith.constant 0.000000e+00 : f32
    %77 = vector.shape_cast %76 : vector<1x16x1xi1> to vector<1x16x1xi1>
    %78 = vector.broadcast %77 : vector<1x16x1xi1> to vector<6x16x8xi1>
    %79 = vector.broadcast %cst_54 : f32 to vector<6x16x8xf32>
    %80 = arith.select %78, %70, %79 : vector<6x16x8xi1>, vector<6x16x8xf32>
    %81 = arith.truncf %80 : vector<6x16x8xf32> to vector<6x16x8xbf16>
    %82 = vector.shape_cast %81 : vector<6x16x8xbf16> to vector<96x8xbf16>
    %c0_55 = arith.constant 0 : index
    %c0_56 = arith.constant 0 : index
    %83 = vector.load %arg11[%c0_55, %c0_56] : memref<104x8xbf16, #tpu.memory_space<vmem>>, vector<96x8xbf16>
    tpu.vector_store %arg11[%c0_55, %c0_56], %82 {strides = array<i32>} : memref<104x8xbf16, #tpu.memory_space<vmem>>, vector<96x8xbf16>,
    %c0_i32 = arith.constant 0 : i32
    %84 = arith.cmpi eq, %arg1, %c0_i32 : i32
    %85 = arith.extui %84 : i1 to i32
    %c0_i32_57 = arith.constant 0 : i32
    %86 = arith.cmpi ne, %85, %c0_i32_57 : i32
    scf.if %86 {
      %cst_118 = arith.constant 0.000000e+00 : bf16
      %150 = vector.broadcast %cst_118 : bf16 to vector<16x8xbf16>
      %c0_119 = arith.constant 0 : index
      %c0_120 = arith.constant 0 : index
      %151 = vector.load %arg11[%c0_119, %c0_120] : memref<104x8xbf16, #tpu.memory_space<vmem>>, vector<16x8xbf16>
      tpu.vector_store %arg11[%c0_119, %c0_120], %150 {strides = array<i32>} : memref<104x8xbf16, #tpu.memory_space<vmem>>, vector<16x8xbf16>,
    } else {
    }
    %c1_i32_58 = arith.constant 1 : i32
    %87 = arith.cmpi eq, %arg1, %c1_i32_58 : i32
    %88 = arith.extui %87 : i1 to i32
    %c0_i32_59 = arith.constant 0 : i32
    %89 = arith.cmpi ne, %88, %c0_i32_59 : i32
    scf.if %89 {
      %cst_118 = arith.constant 0.000000e+00 : bf16
      %150 = vector.broadcast %cst_118 : bf16 to vector<16x8xbf16>
      %c80 = arith.constant 80 : index
      %c0_119 = arith.constant 0 : index
      %151 = vector.load %arg11[%c80, %c0_119] : memref<104x8xbf16, #tpu.memory_space<vmem>>, vector<16x8xbf16>
      tpu.vector_store %arg11[%c80, %c0_119], %150 {strides = array<i32>} : memref<104x8xbf16, #tpu.memory_space<vmem>>, vector<16x8xbf16>,
    } else {
    }
    %cst_60 = arith.constant 0.000000e+00 : f32
    %90 = vector.broadcast %cst_60 : f32 to vector<64x8xf32>
    %c0_61 = arith.constant 0 : index
    %c0_62 = arith.constant 0 : index
    %91 = vector.load %arg11[%c0_61, %c0_62] : memref<104x8xbf16, #tpu.memory_space<vmem>>, vector<64x8xbf16>
    %c0_63 = arith.constant 0 : index
    %c0_64 = arith.constant 0 : index
    %c0_65 = arith.constant 0 : index
    %92 = vector.load %arg6[%c0_63, %c0_64, %c0_65] : memref<9x8x8xbf16, #tpu.memory_space<vmem>>, vector<1x8x8xbf16>
    %93 = vector.shape_cast %92 : vector<1x8x8xbf16> to vector<8x8xbf16>
    %cst_66 = arith.constant dense<0.000000e+00> : vector<64x8xf32>
    %94 = tpu.matmul %91, %93, %cst_66 {dimension_numbers = #tpu.dot_dimension_numbers<[1], [0], [0], [1], [0, 0, 1, 1], [], []>} : vector<64x8xbf16>, vector<8x8xbf16>, vector<64x8xf32> -> vector<64x8xf32>
    %95 = arith.addf %90, %94 : vector<64x8xf32>
    %c1_67 = arith.constant 1 : index
    %c0_68 = arith.constant 0 : index
    %96 = vector.load %arg11[%c1_67, %c0_68] : memref<104x8xbf16, #tpu.memory_space<vmem>>, vector<64x8xbf16>
    %c1_69 = arith.constant 1 : index
    %c0_70 = arith.constant 0 : index
    %c0_71 = arith.constant 0 : index
    %97 = vector.load %arg6[%c1_69, %c0_70, %c0_71] : memref<9x8x8xbf16, #tpu.memory_space<vmem>>, vector<1x8x8xbf16>
    %98 = vector.shape_cast %97 : vector<1x8x8xbf16> to vector<8x8xbf16>
    %cst_72 = arith.constant dense<0.000000e+00> : vector<64x8xf32>
    %99 = tpu.matmul %96, %98, %cst_72 {dimension_numbers = #tpu.dot_dimension_numbers<[1], [0], [0], [1], [0, 0, 1, 1], [], []>} : vector<64x8xbf16>, vector<8x8xbf16>, vector<64x8xf32> -> vector<64x8xf32>
    %100 = arith.addf %95, %99 : vector<64x8xf32>
    %c2_73 = arith.constant 2 : index
    %c0_74 = arith.constant 0 : index
    %101 = vector.load %arg11[%c2_73, %c0_74] : memref<104x8xbf16, #tpu.memory_space<vmem>>, vector<64x8xbf16>
    %c2_75 = arith.constant 2 : index
    %c0_76 = arith.constant 0 : index
    %c0_77 = arith.constant 0 : index
    %102 = vector.load %arg6[%c2_75, %c0_76, %c0_77] : memref<9x8x8xbf16, #tpu.memory_space<vmem>>, vector<1x8x8xbf16>
    %103 = vector.shape_cast %102 : vector<1x8x8xbf16> to vector<8x8xbf16>
    %cst_78 = arith.constant dense<0.000000e+00> : vector<64x8xf32>
    %104 = tpu.matmul %101, %103, %cst_78 {dimension_numbers = #tpu.dot_dimension_numbers<[1], [0], [0], [1], [0, 0, 1, 1], [], []>} : vector<64x8xbf16>, vector<8x8xbf16>, vector<64x8xf32> -> vector<64x8xf32>
    %105 = arith.addf %100, %104 : vector<64x8xf32>
    %c16 = arith.constant 16 : index
    %c0_79 = arith.constant 0 : index
    %106 = vector.load %arg11[%c16, %c0_79] : memref<104x8xbf16, #tpu.memory_space<vmem>>, vector<64x8xbf16>
    %c3_80 = arith.constant 3 : index
    %c0_81 = arith.constant 0 : index
    %c0_82 = arith.constant 0 : index
    %107 = vector.load %arg6[%c3_80, %c0_81, %c0_82] : memref<9x8x8xbf16, #tpu.memory_space<vmem>>, vector<1x8x8xbf16>
    %108 = vector.shape_cast %107 : vector<1x8x8xbf16> to vector<8x8xbf16>
    %cst_83 = arith.constant dense<0.000000e+00> : vector<64x8xf32>
    %109 = tpu.matmul %106, %108, %cst_83 {dimension_numbers = #tpu.dot_dimension_numbers<[1], [0], [0], [1], [0, 0, 1, 1], [], []>} : vector<64x8xbf16>, vector<8x8xbf16>, vector<64x8xf32> -> vector<64x8xf32>
    %110 = arith.addf %105, %109 : vector<64x8xf32>
    %c17 = arith.constant 17 : index
    %c0_84 = arith.constant 0 : index
    %111 = vector.load %arg11[%c17, %c0_84] : memref<104x8xbf16, #tpu.memory_space<vmem>>, vector<64x8xbf16>
    %c4_85 = arith.constant 4 : index
    %c0_86 = arith.constant 0 : index
    %c0_87 = arith.constant 0 : index
    %112 = vector.load %arg6[%c4_85, %c0_86, %c0_87] : memref<9x8x8xbf16, #tpu.memory_space<vmem>>, vector<1x8x8xbf16>
    %113 = vector.shape_cast %112 : vector<1x8x8xbf16> to vector<8x8xbf16>
    %cst_88 = arith.constant dense<0.000000e+00> : vector<64x8xf32>
    %114 = tpu.matmul %111, %113, %cst_88 {dimension_numbers = #tpu.dot_dimension_numbers<[1], [0], [0], [1], [0, 0, 1, 1], [], []>} : vector<64x8xbf16>, vector<8x8xbf16>, vector<64x8xf32> -> vector<64x8xf32>
    %115 = arith.addf %110, %114 : vector<64x8xf32>
    %c18 = arith.constant 18 : index
    %c0_89 = arith.constant 0 : index
    %116 = vector.load %arg11[%c18, %c0_89] : memref<104x8xbf16, #tpu.memory_space<vmem>>, vector<64x8xbf16>
    %c5_90 = arith.constant 5 : index
    %c0_91 = arith.constant 0 : index
    %c0_92 = arith.constant 0 : index
    %117 = vector.load %arg6[%c5_90, %c0_91, %c0_92] : memref<9x8x8xbf16, #tpu.memory_space<vmem>>, vector<1x8x8xbf16>
    %118 = vector.shape_cast %117 : vector<1x8x8xbf16> to vector<8x8xbf16>
    %cst_93 = arith.constant dense<0.000000e+00> : vector<64x8xf32>
    %119 = tpu.matmul %116, %118, %cst_93 {dimension_numbers = #tpu.dot_dimension_numbers<[1], [0], [0], [1], [0, 0, 1, 1], [], []>} : vector<64x8xbf16>, vector<8x8xbf16>, vector<64x8xf32> -> vector<64x8xf32>
    %120 = arith.addf %115, %119 : vector<64x8xf32>
    %c32 = arith.constant 32 : index
    %c0_94 = arith.constant 0 : index
    %121 = vector.load %arg11[%c32, %c0_94] : memref<104x8xbf16, #tpu.memory_space<vmem>>, vector<64x8xbf16>
    %c6_95 = arith.constant 6 : index
    %c0_96 = arith.constant 0 : index
    %c0_97 = arith.constant 0 : index
    %122 = vector.load %arg6[%c6_95, %c0_96, %c0_97] : memref<9x8x8xbf16, #tpu.memory_space<vmem>>, vector<1x8x8xbf16>
    %123 = vector.shape_cast %122 : vector<1x8x8xbf16> to vector<8x8xbf16>
    %cst_98 = arith.constant dense<0.000000e+00> : vector<64x8xf32>
    %124 = tpu.matmul %121, %123, %cst_98 {dimension_numbers = #tpu.dot_dimension_numbers<[1], [0], [0], [1], [0, 0, 1, 1], [], []>} : vector<64x8xbf16>, vector<8x8xbf16>, vector<64x8xf32> -> vector<64x8xf32>
    %125 = arith.addf %120, %124 : vector<64x8xf32>
    %c33 = arith.constant 33 : index
    %c0_99 = arith.constant 0 : index
    %126 = vector.load %arg11[%c33, %c0_99] : memref<104x8xbf16, #tpu.memory_space<vmem>>, vector<64x8xbf16>
    %c7_100 = arith.constant 7 : index
    %c0_101 = arith.constant 0 : index
    %c0_102 = arith.constant 0 : index
    %127 = vector.load %arg6[%c7_100, %c0_101, %c0_102] : memref<9x8x8xbf16, #tpu.memory_space<vmem>>, vector<1x8x8xbf16>
    %128 = vector.shape_cast %127 : vector<1x8x8xbf16> to vector<8x8xbf16>
    %cst_103 = arith.constant dense<0.000000e+00> : vector<64x8xf32>
    %129 = tpu.matmul %126, %128, %cst_103 {dimension_numbers = #tpu.dot_dimension_numbers<[1], [0], [0], [1], [0, 0, 1, 1], [], []>} : vector<64x8xbf16>, vector<8x8xbf16>, vector<64x8xf32> -> vector<64x8xf32>
    %130 = arith.addf %125, %129 : vector<64x8xf32>
    %c34 = arith.constant 34 : index
    %c0_104 = arith.constant 0 : index
    %131 = vector.load %arg11[%c34, %c0_104] : memref<104x8xbf16, #tpu.memory_space<vmem>>, vector<64x8xbf16>
    %c8_105 = arith.constant 8 : index
    %c0_106 = arith.constant 0 : index
    %c0_107 = arith.constant 0 : index
    %132 = vector.load %arg6[%c8_105, %c0_106, %c0_107] : memref<9x8x8xbf16, #tpu.memory_space<vmem>>, vector<1x8x8xbf16>
    %133 = vector.shape_cast %132 : vector<1x8x8xbf16> to vector<8x8xbf16>
    %cst_108 = arith.constant dense<0.000000e+00> : vector<64x8xf32>
    %134 = tpu.matmul %131, %133, %cst_108 {dimension_numbers = #tpu.dot_dimension_numbers<[1], [0], [0], [1], [0, 0, 1, 1], [], []>} : vector<64x8xbf16>, vector<8x8xbf16>, vector<64x8xf32> -> vector<64x8xf32>
    %135 = arith.addf %130, %134 : vector<64x8xf32>
    %c0_109 = arith.constant 0 : index
    %c0_110 = arith.constant 0 : index
    %136 = vector.load %arg7[%c0_109, %c0_110] : memref<1x8xf32, #tpu.memory_space<vmem>>, vector<1x8xf32>
    %137 = vector.broadcast %136 : vector<1x8xf32> to vector<64x8xf32>
    %138 = arith.mulf %135, %137 : vector<64x8xf32>
    %c0_111 = arith.constant 0 : index
    %c0_112 = arith.constant 0 : index
    %139 = vector.load %arg8[%c0_111, %c0_112] : memref<1x8xf32, #tpu.memory_space<vmem>>, vector<1x8xf32>
    %140 = vector.broadcast %139 : vector<1x8xf32> to vector<64x8xf32>
    %141 = arith.addf %138, %140 : vector<64x8xf32>
    %cst_113 = arith.constant 0.000000e+00 : f32
    %142 = vector.broadcast %cst_113 : f32 to vector<64x8xf32>
    %143 = arith.maximumf %141, %142 : vector<64x8xf32>
    %144 = vector.shape_cast %143 : vector<64x8xf32> to vector<4x16x8xf32>
    %145 = vector.extract_strided_slice %144 {offsets = [0, 0, 0], sizes = [4, 8, 8], strides = [1, 1, 1]} : vector<4x16x8xf32> to vector<4x8x8xf32>
    %146 = arith.truncf %145 : vector<4x8x8xf32> to vector<4x8x8xbf16>
    %c0_114 = arith.constant 0 : index
    %c0_115 = arith.constant 0 : index
    %c0_116 = arith.constant 0 : index
    %c0_117 = arith.constant 0 : index
    %147 = vector.load %arg9[%c0_114, %c0_115, %c0_116, %c0_117] : memref<1x4x8x8xbf16, #tpu.memory_space<vmem>>, vector<1x4x8x8xbf16>
    %148 = vector.shape_cast %147 : vector<1x4x8x8xbf16> to vector<4x8x8xbf16>
    %149 = vector.shape_cast %146 : vector<4x8x8xbf16> to vector<1x4x8x8xbf16>
    tpu.vector_store %arg9[%c0_114, %c0_115, %c0_116, %c0_117], %149 {strides = array<i32>} : memref<1x4x8x8xbf16, #tpu.memory_space<vmem>>, vector<1x4x8x8xbf16>,
    return
  }
  func.func @transform_0(%arg0: i32, %arg1: i32) -> (i32, i32, i32, i32, i32) {
    %c0_i32 = arith.constant 0 : i32
    %c0_i32_0 = arith.constant 0 : i32
    %c0_i32_1 = arith.constant 0 : i32
    %c0_i32_2 = arith.constant 0 : i32
    %c0_i32_3 = arith.constant 0 : i32
    return %arg0, %c0_i32, %c0_i32_0, %c0_i32_1, %c0_i32_2 : i32, i32, i32, i32, i32
  }
  func.func @transform_1(%arg0: i32, %arg1: i32) -> (i32, i32, i32) {
    %c0_i32 = arith.constant 0 : i32
    %c0_i32_0 = arith.constant 0 : i32
    %c0_i32_1 = arith.constant 0 : i32
    %c0_i32_2 = arith.constant 0 : i32
    return %c0_i32, %c0_i32_0, %c0_i32_1 : i32, i32, i32
  }
  func.func @transform_2(%arg0: i32, %arg1: i32) -> (i32, i32) {
    %c0_i32 = arith.constant 0 : i32
    %c0_i32_0 = arith.constant 0 : i32
    %c0_i32_1 = arith.constant 0 : i32
    return %c0_i32, %c0_i32_0 : i32, i32
  }
  func.func @transform_3(%arg0: i32, %arg1: i32) -> (i32, i32) {
    %c0_i32 = arith.constant 0 : i32
    %c0_i32_0 = arith.constant 0 : i32
    %c0_i32_1 = arith.constant 0 : i32
    return %c0_i32, %c0_i32_0 : i32, i32
  }
  func.func @transform_4(%arg0: i32, %arg1: i32) -> (i32, i32, i32) {
    %c0_i32 = arith.constant 0 : i32
    %c0_i32_0 = arith.constant 0 : i32
    %c0_i32_1 = arith.constant 0 : i32
    %c0_i32_2 = arith.constant 0 : i32
    return %c0_i32, %c0_i32_0, %c0_i32_1 : i32, i32, i32
  }
  func.func @transform_5(%arg0: i32, %arg1: i32) -> (i32, i32) {
    %c0_i32 = arith.constant 0 : i32
    %c0_i32_0 = arith.constant 0 : i32
    %c0_i32_1 = arith.constant 0 : i32
    return %c0_i32, %c0_i32_0 : i32, i32
  }
  func.func @transform_6(%arg0: i32, %arg1: i32) -> (i32, i32) {
    %c0_i32 = arith.constant 0 : i32
    %c0_i32_0 = arith.constant 0 : i32
    %c0_i32_1 = arith.constant 0 : i32
    return %c0_i32, %c0_i32_0 : i32, i32
  }
  func.func @transform_7(%arg0: i32, %arg1: i32) -> (i32, i32, i32, i32) {
    %c0_i32 = arith.constant 0 : i32
    %c0_i32_0 = arith.constant 0 : i32
    %c0_i32_1 = arith.constant 0 : i32
    return %arg0, %arg1, %c0_i32, %c0_i32_0 : i32, i32, i32, i32
  }
}

</mosaic_0001>

<bundles_post_ra>
// kernel: down_pallas.1
= control target key start
LH: loop header
LB: loop body
LE: loop exit
PB: predicated region body
PF: predicated region fallthrough
CT: control target
= control target key end

     0   :  { %s4069_s24 = smov 0   ;;  %s4071_s25 = smov 0   ;;  %s4750_s0 = inlined_call_operand.vmem [shape: bf16[2,2,24,16,4], index: 0, kind: input, shape index: {}]   ;;  %s4751_s1 = inlined_call_operand.vmem [shape: bf16[9,4,8], index: 1, kind: input, shape index: {}]   ;;  %s4752_s2 = inlined_call_operand.vmem [shape: f32[1,8], index: 2, kind: input, shape index: {}]   ;;  %s4753_s3 = inlined_call_operand.vmem [shape: f32[1,8], index: 3, kind: input, shape index: {}]   ;;  %s4754_s4 = inlined_call_operand.vmem [shape: bf16[9,8,8], index: 4, kind: input, shape index: {}]   ;;  %s4755_s5 = inlined_call_operand.vmem [shape: f32[1,8], index: 5, kind: input, shape index: {}]   ;;  %s4756_s6 = inlined_call_operand.vmem [shape: f32[1,8], index: 6, kind: input, shape index: {}]   ;;  %s4757_s7 = inlined_call_operand.vmem [shape: bf16[2,8,8,8], index: 7, kind: output, shape index: {}]  }
   0x1   :  { %s4073_s26 = smov 0   ;;  %s4075_s27 = smov 0  }
   0x2   :  { %s4077_s28 = smov 0  }
   0x3 LB: > { %s26_s29 = sadd.s32 1, %s4017_s26  ;;  %s29_s30 = sadd.s32 1, %s4021_s27  ;;  %s4025_s28 = sphi %s4077_s28, %s17_s28   ;;  %s4021_s27 = sphi %s4075_s27, %s4761_s27   ;;  %s4017_s26 = sphi %s4073_s26, %s4760_s26   ;;  %s4013_s25 = sphi %s4071_s25, %s4759_s25   ;;  %s4009_s24 = sphi %s4069_s24, %s4758_s24  }
   0x4   : > { %p27_p0 = scmp.ge.s32.totalorder %s26_s29, 2  ;;  %p3195_p1 = scmp.ge.s32.totalorder %s4025_s28, 1 }
   0x5   : > { %p251_p2 = scmp.lt.s32.totalorder %s4025_s28, 5 }
   0x6   : > { %s4763_s29 = smov (%p27_p0, %s26_s29), 0  ;;  %s4765_s30 = smov (!%p27_p0, %s29_s30), %s4021_s27 }
   0x7   : > { %p252_p3 = pnand %p3195_p1, %p251_p2  ;;  %p31_p4 = scmp.ge.s32.totalorder %s4765_s30, 2 }
   0x8   : > { %v4104_v0 = vld [vmem:[%s4751_s1] sm:$0x3] (!%p252_p3)  ;;  %vm534_vm0 = vcmask (!%p252_p3), 1041408   ;;  %p287_p5 = scmp.lt.s32.totalorder (!%p252_p3), %s4013_s25, 1  ;;  %s3197_s10 = sshll.u32 (!%p252_p3), %s4009_s24, 2  ;;  %vm472_vm1 = vcmask (!%p252_p3), 31748  }
   0x9   : > { %s4767_s30 = smov (%p31_p4, %s4765_s30), 0  ;;  %255 = sbr.rel (%p252_p3) target bundleno = 827 (0x33b), region = 48 }
   0xa   : > { %3900 = vmatprep.subr.msk.bf16.mxu0 (!%p252_p3), %vm534_vm0, %v4104_v0  ;;  %v4111_v1 = vsel (!%p252_p3), %vm534_vm0, %v4104_v0, 0  ;;  %p295_p6 = scmp.lt.s32.totalorder (!%p252_p3), %s3197_s10, 7  ;;  %s3399_s11 = sshll.u32 (!%p252_p3), %s4009_s24, 6  ;;  %v4118_v2 = vld [vmem:[%s4751_s1 + $0x4] sm:$0x3] (!%p252_p3)  ;;  %vm474_vm2 = vcmask (!%p252_p3), 31744  }
   0xb   : > { %3536 = vmatpush3.bf16.msra.mxu0 (!%p252_p3), %v4111_v1  ;;  %vm619_vm3 = vsmask.f32 (!%p252_p3), 4352  ;;  %vm787_vm4 = vsmask.f32 (!%p252_p3), 3328  ;;  %vm502_vm5 = vcmask (!%p252_p3), 1043456   ;;  %vm482_vm6 = vcmask (!%p252_p3), 27648  }
   0xc   : > { %3902 = vmatprep.subr.msk.bf16.mxu0 (!%p252_p3), %vm534_vm0, %v4118_v2  ;;  %vm2014_vm9 = vcmask (!%p252_p3), 60416   ;;  %p3322_p7 = scmp.ne.s32.totalorder (!%p252_p3), %s4009_s24, 0 }
  0x10   : > { %s4769_s25 = smov (!%p287_p5, %s4013_s25), 1  ;;  %s4771_s10 = smov (!%p295_p6, %s3197_s10), 7 }
  0x11   : > { %s3918_s14 = smul.u32 384, %s4769_s25  ;;  %s3198_s15 = sshll.u32 %s4769_s25, 3 }
  0x12   : > { %s298_s16 = sadd.s32 %s3198_s15, %s4771_s10 }
  0x13   : > { %s291_s19 = scalar_lea.vmem %s4750_s0, %s3918_s14  ;;  %s3199_s20 = sshll.u32 %s298_s16, 2 }
  0x14   : > { %s4128_s23 = scalar_lea.vmem %s4757_s7, %s3199_s20  ;;  %s4130_s8 = scalar_lea.vmem %s291_s19, %s3399_s11 }
  0x15   : > { %v307_v3 = vld [vmem:[%s4130_s8] sm:$0xf]  ;;  %v308_v4 = vld [vmem:[%s4130_s8 + $0x4] sm:$0xf]  ;;  %v309_v5 = vld [vmem:[%s4130_s8 + $0x8] sm:$0xf] }
  0x16   : > { %v310_v6 = vld [vmem:[%s4130_s8 + $0xc] sm:$0xf]  ;;  %v311_v7 = vld [vmem:[%s4130_s8 + $0x10] sm:$0xf]  ;;  %v313_v8 = vld [vmem:[%s4130_s8 + $0x18] sm:$0xf] }
  0x17   : > { %v3205_v9 = vld [vmem:[%s4130_s8 + $0xc0] sm:$0xf]  ;;  %v3206_v10 = vld [vmem:[%s4130_s8 + $0xc4] sm:$0xf]  ;;  %v3207_v11 = vld [vmem:[%s4130_s8 + $0xc8] sm:$0xf] }
  0x18   : > { %v3208_v12 = vld [vmem:[%s4130_s8 + $0xcc] sm:$0xf]  ;;  %v3209_v13 = vld [vmem:[%s4130_s8 + $0xd0] sm:$0xf]  ;;  %v3211_v14 = vld [vmem:[%s4130_s8 + $0xd8] sm:$0xf]  ;;  %v374_v15 = vmax.bf16 %v3205_v9, %v307_v3  ;;  %v375_v16 = vmax.bf16 %v3206_v10, %v308_v4  ;;  %v376_v17 = vmax.bf16 %v3207_v11, %v309_v5 }
  0x19   : > { %v377_v18 = vmax.bf16 %v3208_v12, %v310_v6  ;;  %v378_v19 = vmax.bf16 %v3209_v13, %v311_v7  ;;  %v380_v20 = vmax.bf16 %v3211_v14, %v313_v8  ;;  %v312_v21 = vld [vmem:[%s4130_s8 + $0x14] sm:$0xf]  ;;  %v314_v22 = vld [vmem:[%s4130_s8 + $0x1c] sm:$0xf]  ;;  %v315_v23 = vld [vmem:[%s4130_s8 + $0x20] sm:$0xf] }
  0x1a   : > { %v406_v24 = vmax.bf16 %v376_v17, %v374_v15  ;;  %v317_v25 = vld [vmem:[%s4130_s8 + $0x28] sm:$0xf]  ;;  %v3210_v26 = vld [vmem:[%s4130_s8 + $0xd4] sm:$0xf]  ;;  %v3212_v27 = vld [vmem:[%s4130_s8 + $0xdc] sm:$0xf] }
  0x1b   : > { %v407_v28 = vmax.bf16 %v377_v18, %v375_v16  ;;  %v408_v29 = vmax.bf16 %v380_v20, %v378_v19  ;;  %v3213_v30 = vld [vmem:[%s4130_s8 + $0xe0] sm:$0xf]  ;;  %v3215_v31 = vld [vmem:[%s4130_s8 + $0xe8] sm:$0xf]  ;;  %v379_v32 = vmax.bf16 %v3210_v26, %v312_v21  ;;  %v381_v33 = vmax.bf16 %v3212_v27, %v314_v22  ;;  %v316_v34 = vld [vmem:[%s4130_s8 + $0x24] sm:$0xf] }
  0x1c   : > { %v3237_v35 = vcombine.low %v406_v24, %v406_v24  ;;  %v382_v36 = vmax.bf16 %v3213_v30, %v315_v23  ;;  %v384_v37 = vmax.bf16 %v3215_v31, %v317_v25  ;;  %v318_v38 = vld [vmem:[%s4130_s8 + $0x2c] sm:$0xf]  ;;  %v319_v39 = vld [vmem:[%s4130_s8 + $0x30] sm:$0xf]  ;;  %v321_v40 = vld [vmem:[%s4130_s8 + $0x38] sm:$0xf] }
  0x1d   : > { %v3238_v41 = vcombine.low %v407_v28, %v408_v29  ;;  %v409_v42 = vmax.bf16 %v381_v33, %v379_v32  ;;  %v3214_v43 = vld [vmem:[%s4130_s8 + $0xe4] sm:$0xf]  ;;  %v3216_v44 = vld [vmem:[%s4130_s8 + $0xec] sm:$0xf]  ;;  %v3217_v45 = vld [vmem:[%s4130_s8 + $0xf0] sm:$0xf] }
  0x1e   : > { %473 = vst.msk [vmem:[#allocation2] sm:$0xf0] %vm472_vm1, %v3237_v35  ;;  %v410_v46 = vmax.bf16 %v384_v37, %v382_v36  ;;  %v3219_v47 = vld [vmem:[%s4130_s8 + $0xf8] sm:$0xf]  ;;  %v383_v48 = vmax.bf16 %v3214_v43, %v316_v34  ;;  %v385_v49 = vmax.bf16 %v3216_v44, %v318_v38  ;;  %v386_v50 = vmax.bf16 %v3217_v45, %v319_v39  ;;  %v320_v51 = vld [vmem:[%s4130_s8 + $0x34] sm:$0xf] }
  0x1f   : > { %v322_v52 = vld [vmem:[%s4130_s8 + $0x3c] sm:$0xf]  ;;  %475 = vst.msk [vmem:[#allocation2 + $0x8] sm:$0xff] %vm474_vm2, %v3238_v41  ;;  %v388_v53 = vmax.bf16 %v3219_v47, %v321_v40  ;;  %v323_v54 = vld [vmem:[%s4130_s8 + $0x40] sm:$0xf] }
  0x20   : > { %v325_v55 = vld [vmem:[%s4130_s8 + $0x48] sm:$0xf]  ;;  %v3218_v56 = vld [vmem:[%s4130_s8 + $0xf4] sm:$0xf]  ;;  %v3239_v57 = vcombine.low %v409_v42, %v410_v46  ;;  %v411_v58 = vmax.bf16 %v385_v49, %v383_v48  ;;  %v3220_v59 = vld [vmem:[%s4130_s8 + $0xfc] sm:$0xf] }
  0x21   : > { %v3221_v60 = vld [vmem:[%s4130_s8 + $0x100] sm:$0xf]  ;;  %v3223_v61 = vld [vmem:[%s4130_s8 + $0x108] sm:$0xf]  ;;  %v387_v62 = vmax.bf16 %v3218_v56, %v320_v51  ;;  %v412_v63 = vmax.bf16 %v388_v53, %v386_v50  ;;  %v389_v3 = vmax.bf16 %v3220_v59, %v322_v52  ;;  %v324_v6 = vld [vmem:[%s4130_s8 + $0x44] sm:$0xf] }
  0x22   : > { %v390_v4 = vmax.bf16 %v3221_v60, %v323_v54  ;;  %v392_v5 = vmax.bf16 %v3223_v61, %v325_v55  ;;  %v326_v7 = vld [vmem:[%s4130_s8 + $0x4c] sm:$0xf]  ;;  %v327_v8 = vld [vmem:[%s4130_s8 + $0x50] sm:$0xf]  ;;  %476 = vst.msk [vmem:[#allocation2 + $0x10] sm:$0xff] %vm474_vm2, %v3239_v57 }
  0x23   : > { %v329_v9 = vld [vmem:[%s4130_s8 + $0x58] sm:$0xf]  ;;  %v3222_v10 = vld [vmem:[%s4130_s8 + $0x104] sm:$0xf]  ;;  %v3224_v11 = vld [vmem:[%s4130_s8 + $0x10c] sm:$0xf]  ;;  %v3240_v12 = vcombine.low %v411_v58, %v412_v63  ;;  %v413_v13 = vmax.bf16 %v389_v3, %v387_v62 }
  0x24   : > { %v414_v14 = vmax.bf16 %v392_v5, %v390_v4  ;;  %v3225_v15 = vld [vmem:[%s4130_s8 + $0x110] sm:$0xf]  ;;  %v3227_v16 = vld [vmem:[%s4130_s8 + $0x118] sm:$0xf]  ;;  %v391_v17 = vmax.bf16 %v3222_v10, %v324_v6  ;;  %v393_v18 = vmax.bf16 %v3224_v11, %v326_v7  ;;  %v328_v33 = vld [vmem:[%s4130_s8 + $0x54] sm:$0xf] }
  0x25   : > { %v394_v19 = vmax.bf16 %v3225_v15, %v327_v8  ;;  %v396_v20 = vmax.bf16 %v3227_v16, %v329_v9  ;;  %v484_v21 = vld [vmem:[#allocation2] sm:$0xf8]  ;;  %477 = vst.msk [vmem:[#allocation2 + $0x18] sm:$0xff] %vm474_vm2, %v3240_v12  ;;  %v3226_v38 = vld [vmem:[%s4130_s8 + $0x114] sm:$0xf]  ;;  %v844_v4 = vsel %vm534_vm0, %v4118_v2, 0 }
  0x26   : > { %v4179_v22 = vld [vmem:[#allocation2] sm:$0xf0]  ;;  %v3241_v23 = vcombine.low %v413_v13, %v414_v14  ;;  %v4182_v24 = vld [vmem:[#allocation2 + $0x8] sm:$0xff]  ;;  %v621_v25 = vshrl.u32 %v484_v21, 16  ;;  %v624_v26 = vshll.u32 %v484_v21, 16  ;;  %v415_v31 = vmax.bf16 %v393_v18, %v391_v17 }
  0x27   : > { %v789_v27 = vshrl.u32 %v4179_v22, 16  ;;  %v792_v28 = vshll.u32 %v4179_v22, 16  ;;  %v629_v29 = vshrl.u32 %v4182_v24, 16  ;;  %v632_v30 = vshll.u32 %v4182_v24, 16  ;;  %v330_v47 = vld [vmem:[%s4130_s8 + $0x5c] sm:$0xf] }
  0x28   : > { %478 = vst.msk [vmem:[#allocation2 + $0x20] sm:$0xff] %vm474_vm2, %v3241_v23  ;;  %v416_v32 = vmax.bf16 %v396_v20, %v394_v19  ;;  %v623_v34 = vrot.slane %v621_v25, 3  ;;  %v626_v35 = vrot.slane %v624_v26, 4  ;;  %v331_v52 = vld [vmem:[%s4130_s8 + $0x60] sm:$0xf]  ;;  %v395_v58 = vmax.bf16 %v3226_v38, %v328_v33 }
  0x29   : > { %v791_v36 = vrot.slane %v789_v27, 4  ;;  %v794_v37 = vrot.slane %v792_v28, 5  ;;  %v631_v39 = vrot.slane %v629_v29, 3  ;;  %v634_v40 = vrot.slane %v632_v30, 4  ;;  %v4191_v41 = vld [vmem:[#allocation2 + $0x10] sm:$0xff] }
  0x2a   : > { %v796_v42 = vrot.slane %v629_v29, 4  ;;  %v797_v43 = vrot.slane %v632_v30, 5  ;;  %v627_v44 = vor.u32 %v626_v35, %v623_v34  ;;  %v638_v45 = vshrl.u32 %v4191_v41, 16  ;;  %v3228_v53 = vld [vmem:[%s4130_s8 + $0x11c] sm:$0xf] }
  0x2b   : > { %v641_v46 = vshll.u32 %v4191_v41, 16  ;;  %v635_v48 = vor.u32 %v634_v40, %v631_v39  ;;  %v795_v49 = vor.u32 %v794_v37, %v791_v36  ;;  %v3242_v51 = vcombine.low %v415_v31, %v416_v32  ;;  %v3229_v54 = vld [vmem:[%s4130_s8 + $0x120] sm:$0xf]  ;;  %v333_v60 = vld [vmem:[%s4130_s8 + $0x68] sm:$0xf] }
  0x2c   : > { %v4196_v50 = vor.u32 %v797_v43, %v796_v42  ;;  %v640_v55 = vrot.slane %v638_v45, 3  ;;  %v4201_v57 = vld [vmem:[#allocation2 + $0x18] sm:$0xff]  ;;  %v3231_v61 = vld [vmem:[%s4130_s8 + $0x128] sm:$0xf]  ;;  %v397_v63 = vmax.bf16 %v3228_v53, %v330_v47  ;;  %v398_v3 = vmax.bf16 %v3229_v54, %v331_v52  ;;  %v3266_v9 = vld [vmem:[%s4751_s1 + $0x6] sm:$0x3] }
  0x2d   : > { %v643_v56 = vrot.slane %v641_v46, 4  ;;  %v636_v59 = vsel %vm619_vm3, %v627_v44, %v635_v48  ;;  %479 = vst.msk [vmem:[#allocation2 + $0x28] sm:$0xff] %vm474_vm2, %v3242_v51  ;;  %v647_v6 = vshrl.u32 %v4201_v57, 16  ;;  %v650_v7 = vshll.u32 %v4201_v57, 16  ;;  %v4226_v12 = vld [vmem:[%s4751_s1 + $0x2] sm:$0x3] }
  0x2e   : > { %3537 = vmatprep.mubr.msk.bf16.mxu0 %vm474_vm2, %v636_v59  ;;  %v799_v5 = vsel %vm787_vm4, %v795_v49, %v4196_v50  ;;  %v400_v11 = vmax.bf16 %v3231_v61, %v333_v60  ;;  %v417_v2 = vmax.bf16 %v397_v63, %v395_v58  ;;  %v332_v13 = vld [vmem:[%s4130_s8 + $0x64] sm:$0xf]  ;;  %v334_v14 = vld [vmem:[%s4130_s8 + $0x6c] sm:$0xf]  ;;  %v335_v15 = vld [vmem:[%s4130_s8 + $0x70] sm:$0xf]  ;;  %3899 = vmatprep.subr.msk.bf16.mxu1 %vm534_vm0, %v4226_v12 }
  0x2f   : > { %v4208_v62 = vor.u32 %v643_v56, %v640_v55  ;;  %v4221_v10 = vld [vmem:[#allocation2 + $0x20] sm:$0xff]  ;;  %v800_v16 = vrot.slane %v638_v45, 4  ;;  %v801_v17 = vrot.slane %v641_v46, 5  ;;  %v3232_v20 = vld [vmem:[%s4130_s8 + $0x12c] sm:$0xf]  ;;  %v804_v21 = vrot.slane %v647_v6, 4 }
  0x30   : > { %v418_v18 = vmax.bf16 %v400_v11, %v398_v3  ;;  %v3230_v19 = vld [vmem:[%s4130_s8 + $0x124] sm:$0xf]  ;;  %v805_v23 = vrot.slane %v650_v7, 5  ;;  %v656_v25 = vshrl.u32 %v4221_v10, 16  ;;  %v3233_v26 = vld [vmem:[%s4130_s8 + $0x130] sm:$0xf]  ;;  %v401_v36 = vmax.bf16 %v3232_v20, %v334_v14 }
  0x31   : > { %v645_v8 = vsel %vm619_vm3, %v635_v48, %v4208_v62  ;;  %v659_v27 = vshll.u32 %v4221_v10, 16  ;;  %v337_v32 = vld [vmem:[%s4130_s8 + $0x78] sm:$0xf]  ;;  %v399_v34 = vmax.bf16 %v3230_v19, %v332_v13  ;;  %v802_v35 = vor.u32 %v801_v17, %v800_v16  ;;  %v939_v44 = vld [vmem:[#allocation2 + $0x8] sm:$0xf8] }
  0x32   : > { %3538 = vmatmul.mubr.msk.bf16.vlgmr.msra.gmra.mrb[0].mxu0 %vm474_vm2, %v645_v8  ;;  %v3243_v29 = vcombine.low %v417_v2, %v418_v18  ;;  %v3235_v33 = vld [vmem:[%s4130_s8 + $0x138] sm:$0xf]  ;;  %v402_v37 = vmax.bf16 %v3233_v26, %v335_v15  ;;  %v4252_v38 = vor.u32 %v805_v23, %v804_v21  ;;  %v808_v39 = vrot.slane %v656_v25, 4  ;;  %v4261_v52 = vld [vmem:[#allocation2 + $0x8] sm:$0xf0] }
  0x33   : > { %3550 = vmatpush3.bf16.msra.mxu0 %v844_v4  ;;  %3551 = vmatprep.mubr.msk.bf16.mxu0 %vm474_vm2, %v799_v5  ;;  %v809_v40 = vrot.slane %v659_v27, 5  ;;  %v404_v45 = vmax.bf16 %v3235_v33, %v337_v32  ;;  %v419_v46 = vmax.bf16 %v401_v36, %v399_v34  ;;  %v803_v47 = vsel %vm787_vm4, %v4196_v50, %v802_v35  ;;  %v1415_v53 = vld [vmem:[#allocation2 + $0x10] sm:$0xf8]  ;;  %v4271_v50 = vld [vmem:[%s4751_s1 + $0x8] sm:$0x3] }
  0x34   : > { %3903 = vmatprep.subr.msk.bf16.mxu0 %vm534_vm0, %v3266_v9  ;;  %v4245_v28 = vld [vmem:[#allocation2 + $0x28] sm:$0xff]  ;;  %480 = vst.msk [vmem:[#allocation2 + $0x30] sm:$0xff] %vm474_vm2, %v3243_v29  ;;  %v1029_v48 = vsel %vm534_vm0, %v3266_v9, 0  ;;  %v658_v49 = vrot.slane %v656_v25, 3  ;;  %v4265_v54 = vsel %vm787_vm4, %v802_v35, %v4252_v38  ;;  %v949_v55 = vshrl.u32 %v939_v44, 16 }
  0x35   : > { %v665_v30 = vshrl.u32 %v4245_v28, 16  ;;  %v668_v31 = vshll.u32 %v4245_v28, 16  ;;  %v420_v51 = vmax.bf16 %v404_v45, %v402_v37  ;;  %v952_v56 = vshll.u32 %v939_v44, 16 }
  0x36   : > { %v1265_v58 = vshrl.u32 %v4261_v52, 16  ;;  %v661_v59 = vrot.slane %v659_v27, 4  ;;  %v810_v60 = vor.u32 %v809_v40, %v808_v39  ;;  %v1268_v8 = vshll.u32 %v4261_v52, 16 }
  0x37   : > { %v812_v42 = vrot.slane %v665_v30, 4  ;;  %v813_v43 = vrot.slane %v668_v31, 5  ;;  %v3244_v63 = vcombine.low %v419_v46, %v420_v51  ;;  %v1425_v9 = vshrl.u32 %v1415_v53, 16 }
  0x38   : > { %v1267_v5 = vrot.slane %v1265_v58, 4  ;;  %v951_v15 = vrot.slane %v949_v55, 3  ;;  %v954_v16 = vrot.slane %v952_v56, 4  ;;  %v1270_v17 = vrot.slane %v1268_v8, 5  ;;  %v3234_v56 = vld [vmem:[%s4130_s8 + $0x134] sm:$0xf] }
  0x39   : > { %v814_v61 = vor.u32 %v813_v43, %v812_v42  ;;  %481 = vst.msk [vmem:[#allocation2 + $0x38] sm:$0xff] %vm474_vm2, %v3244_v63  ;;  %v1428_v18 = vshll.u32 %v1415_v53, 16  ;;  %v4286_v19 = vsel %vm787_vm4, %v4252_v38, %v810_v60  ;;  %v1427_v23 = vrot.slane %v1425_v9, 3  ;;  %v336_v53 = vld [vmem:[%s4130_s8 + $0x74] sm:$0xf] }
  0x3a   : > { %v1271_v26 = vor.u32 %v1270_v17, %v1267_v5  ;;  %v1435_v36 = vrot.slane %v647_v6, 3  ;;  %v1438_v40 = vrot.slane %v650_v7, 4  ;;  %v1448_v42 = vor.u32 %v661_v59, %v658_v49  ;;  %v3236_v58 = vld [vmem:[%s4130_s8 + $0x13c] sm:$0xf] }
  0x3b   : > { %v784_v3 = vld [vmem:[#allocation2 + $0x30] sm:$0x1f]  ;;  %v4289_v20 = vsel %vm787_vm4, %v810_v60, %v814_v61  ;;  %v1430_v34 = vrot.slane %v1428_v18, 4  ;;  %v1456_v7 = vrot.slane %v668_v31, 4  ;;  %v955_v46 = vor.u32 %v954_v16, %v951_v15  ;;  %v338_v31 = vld [vmem:[%s4130_s8 + $0x7c] sm:$0xf] }
  0x3c   : > { %v4274_v4 = vld [vmem:[#allocation2 + $0x30] sm:$0xff]  ;;  %v817_v11 = vshrl.u32 %v784_v3, 16  ;;  %v820_v2 = vshll.u32 %v784_v3, 16  ;;  %v4294_v37 = vsel %vm787_vm4, %v1271_v26, %v802_v35  ;;  %v1439_v6 = vor.u32 %v1438_v40, %v1435_v36  ;;  %v3280_v36 = vld [vmem:[%s4751_s1 + $0xa] sm:$0x3] }
  0x3d   : > { %v993_v13 = vshrl.u32 %v4274_v4, 16  ;;  %v996_v14 = vshll.u32 %v4274_v4, 16  ;;  %v1431_v43 = vor.u32 %v1430_v34, %v1427_v23  ;;  %v1453_v35 = vrot.slane %v665_v30, 3 }
  0x3e   : > { %3552 = vmatmul.mubr.msk.bf16.vlgmr.msra.gmra.mrb[0].mxu0 %vm474_vm2, %v803_v47  ;;  %v819_v21 = vrot.slane %v817_v11, 4  ;;  %v822_v25 = vrot.slane %v820_v2, 5  ;;  %v4318_v49 = vsel %vm619_vm3, %v1439_v6, %v1448_v42  ;;  %v4327_v55 = vrot.slane %v4191_v41, 4 }
  0x3f   : > { %3564 = vmatpush3.bf16.msra.mxu0 %v1029_v48  ;;  %3555 = vmatprep.mubr.msk.bf16.mxu0 %vm474_vm2, %v4265_v54  ;;  %v1288_v27 = vrot.slane %v993_v13, 4  ;;  %v1289_v29 = vrot.slane %v996_v14, 5  ;;  %v995_v32 = vrot.slane %v993_v13, 3  ;;  %v998_v33 = vrot.slane %v996_v14, 4  ;;  %v1600_v14 = vld [vmem:[#allocation2 + $0x10] sm:$0xf0] }
  0x40   : > { %3904 = vmatprep.subr.msk.bf16.mxu0 %vm534_vm0, %v4271_v50  ;;  %v823_v45 = vor.u32 %v822_v25, %v819_v21  ;;  %v4315_v48 = vsel %vm619_vm3, %v1431_v43, %v1439_v6  ;;  %v4320_v51 = vor.u32 %v1456_v7, %v1453_v35  ;;  %v4322_v30 = vld [vmem:[#allocation2 + $0x38] sm:$0xff]  ;;  %v1137_v59 = vrot.slane %v4201_v57, 4 }
  0x41   : > { %v4296_v39 = vor.u32 %v1289_v29, %v1288_v27  ;;  %v4312_v47 = vor.u32 %v998_v33, %v995_v32  ;;  %v536_v3 = vsel %vm534_vm0, %v4226_v12, 0  ;;  %v503_v41 = vrot.slane %v4179_v22, 4 }
  0x42   : > { %v4334_v60 = vsel %vm619_vm3, %v1448_v42, %v4320_v51  ;;  %v824_v5 = vsel %vm787_vm4, %v814_v61, %v823_v45  ;;  %3522 = vmatpush3.bf16.msra.mxu1 %v536_v3  ;;  %v504_v8 = vrot.slane %v4182_v24, 4  ;;  %v1469_v57 = vshrl.u32 %v4322_v30, 16  ;;  %v490_v42 = vld [vmem:[#allocation2 + $0x30] sm:$0xf] }
  0x43   : > { %v4304_v44 = vsel %vm787_vm4, %v814_v61, %v4296_v39  ;;  %v4339_v63 = vsel %vm619_vm3, %v4320_v51, %v4312_v47  ;;  %v964_v9 = vsel %vm619_vm3, %v955_v46, %v4208_v62  ;;  %v1472_v11 = vshll.u32 %v4322_v30, 16  ;;  %3901 = vmatprep.subr.msk.bf16.mxu1 %vm534_vm0, %v4104_v0 }
  0x44   : > { %v403_v2 = vmax.bf16 %v3234_v56, %v336_v53  ;;  %v405_v13 = vmax.bf16 %v3236_v58, %v338_v31  ;;  %v505_v12 = vsel %vm502_vm5, %v503_v41, %v504_v8  ;;  %v507_v22 = vsel %vm502_vm5, %v504_v8, %v4327_v55 }
  0x45   : > { %v1471_v61 = vrot.slane %v1469_v57, 3  ;;  %3523 = vmatprep.mubr.msk.bf16.mxu1 %vm474_vm2, %v505_v12  ;;  %v1474_v24 = vrot.slane %v1472_v11, 4  ;;  %v4360_v16 = vsel %vm502_vm5, %v4327_v55, %v1137_v59  ;;  %v1610_v0 = vrot.slane %v1600_v14, 4 }
  0x46   : > { %3556 = vmatmul.mubr.msk.bf16.gmra.mrb[4].mxu0 %vm474_vm2, %v4286_v19  ;;  %v421_v15 = vmax.bf16 %v405_v13, %v403_v2  ;;  %3524 = vmatmul.mubr.msk.bf16.vlgmr.msra.gmra.mrb[0].mxu1 %vm474_vm2, %v507_v22  ;;  %v4369_v21 = vrot.slane %v4274_v4, 4  ;;  %v1619_v25 = vrot.slane %v4322_v30, 4  ;;  %v973_v26 = vsel %vm619_vm3, %v4208_v62, %v1439_v6  ;;  %v945_v62 = vld [vmem:[#allocation2 + $0x38] sm:$0xf] }
  0x47   : > { %3559 = vmatprep.mubr.msk.bf16.mxu0 %vm474_vm2, %v4289_v20  ;;  %v4363_v17 = vor.u32 %v1474_v24, %v1471_v61  ;;  %3527 = vmatprep.mubr.msk.bf16.mxu1 %vm474_vm2, %v4360_v16  ;;  %v4372_v23 = vsel %vm502_vm5, %v1610_v0, %v1137_v59  ;;  %v1139_v29 = vrot.slane %v4221_v10, 4  ;;  %v1741_v4 = vshrl.u32 %v1600_v14, 16  ;;  %v1261_v61 = vld [vmem:[#allocation2 + $0x38] sm:$0x1f]  ;;  %v3294_v24 = vld [vmem:[%s4751_s1 + $0xe] sm:$0x3] }
  0x48   : > { %v3245_v18 = vcombine.low %v421_v15, %v421_v15  ;;  %3738 = vmatpush3.bf16.msra.mxu1 %v4111_v1  ;;  %v4387_v1 = vsel %vm502_vm5, %v4369_v21, %v1619_v25  ;;  %v1744_v32 = vshll.u32 %v1600_v14, 16  ;;  %v1166_v33 = vsel %vm534_vm0, %v4271_v50, 0 }
  0x49   : > { %v4380_v27 = vsel %vm619_vm3, %v4312_v47, %v4363_v17  ;;  %v1141_v34 = vrot.slane %v4245_v28, 4  ;;  %v1743_v40 = vrot.slane %v1741_v4, 4  ;;  %v1764_v43 = vrot.slane %v1469_v57, 4 }
  0x4a   : > { %483 = vst.msk [vmem:[#allocation2 + $0x40] sm:$0xf] %vm482_vm6, %v3245_v18  ;;  %v1746_v10 = vrot.slane %v1744_v32, 5  ;;  %v1765_v6 = vrot.slane %v1472_v11, 5  ;;  %v1002_v35 = vshrl.u32 %v945_v62, 16  ;;  %v1005_v50 = vshll.u32 %v945_v62, 16 }
  0x4b   : > { %v4399_v7 = vsel %vm502_vm5, %v1137_v59, %v1139_v29  ;;  %v4403_v45 = vsel %vm502_vm5, %v1139_v29, %v1141_v34  ;;  %v514_v53 = vrot.slane %v490_v42, 4  ;;  %v1134_v41 = vrot.slane %v4261_v52, 4  ;;  %v3301_v29 = vld [vmem:[%s4751_s1 + $0x10] sm:$0x3] }
  0x4c   : > { %v1747_v28 = vor.u32 %v1746_v10, %v1743_v40  ;;  %v4407_v46 = vor.u32 %v1765_v6, %v1764_v43  ;;  %v1004_v58 = vrot.slane %v1002_v35, 3  ;;  %v1007_v59 = vrot.slane %v1005_v50, 4 }
  0x4d   : > { %v515_v3 = vsel %vm502_vm5, %v1141_v34, %v514_v53  ;;  %v677_v8 = vshll.u32 %v490_v42, 16  ;;  %v1320_v13 = vsel %vm534_vm0, %v3280_v36, 0  ;;  %v1144_v14 = vsel %vm502_vm5, %v1141_v34, %v4369_v21 }
  0x4e   : > { %3560 = vmatmul.mubr.msk.bf16.gmra.mrb[8].mxu0 %vm474_vm2, %v824_v5  ;;  %3528 = vmatmul.mubr.msk.bf16.gmra.mrb[4].mxu1 %vm474_vm2, %v4399_v7  ;;  %v4413_v31 = vsel %vm787_vm4, %v1747_v28, %v4252_v38  ;;  %v4418_v56 = vsel %vm787_vm4, %v4296_v39, %v4407_v46  ;;  %v1008_v5 = vor.u32 %v1007_v59, %v1004_v58  ;;  %v674_v38 = vshrl.u32 %v490_v42, 16  ;;  %v4539_v58 = vld [vmem:[%s4753_s3] ss:$0 sm:$0xff] }
  0x4f   : > { %3565 = vmatprep.mubr.msk.bf16.mxu0 %vm474_vm2, %v964_v9  ;;  %3531 = vmatprep.mubr.msk.bf16.mxu1 %vm474_vm2, %v4403_v45  ;;  %v1136_v9 = vsel %vm502_vm5, %v1134_v41, %v4327_v55  ;;  %v679_v2 = vrot.slane %v677_v8, 4  ;;  %v1293_v15 = vshrl.u32 %v1261_v61, 16  ;;  %v1941_v28 = vlaneseq }
  0x50   : > { %v1009_v57 = vsel %vm619_vm3, %v4312_v47, %v1008_v5  ;;  %v676_v11 = vrot.slane %v674_v38, 3  ;;  %v3287_v47 = vld [vmem:[%s4751_s1 + $0xc] sm:$0x3] }
  0x51   : > { %v1505_v22 = vsel %vm534_vm0, %v3287_v47, 0  ;;  %v1295_v0 = vrot.slane %v1293_v15, 4  ;;  %v4534_v53 = vshrl.u32 %v1941_v28, 7 }
  0x52   : > { %v680_v52 = vor.u32 %v679_v2, %v676_v11 }
  0x53   : > { %vm1944_vm7 = vcmp.ge.s32.totalorder %v4534_v53, 1 }
  0x54   : > { %v681_v55 = vsel %vm619_vm3, %v4320_v51, %v680_v52  ;;  %v1145_v51 = vrot.slane %v945_v62, 4 }
  0x56   : > { %3566 = vmatmul.mubr.msk.bf16.vlgmr.msra.gmra.mrb[0].mxu0 %vm474_vm2, %v973_v26  ;;  %3532 = vmatmul.mubr.msk.bf16.gmra.mrb[8].mxu1 %vm474_vm2, %v515_v3  ;;  %v1146_v12 = vsel %vm502_vm5, %v4369_v21, %v1145_v51  ;;  %v1642_v21 = vsel %vm534_vm0, %v3294_v24, 0 }
  0x57   : > { %3578 = vmatpush3.bf16.msra.mxu0 %v1166_v33  ;;  %3569 = vmatprep.mubr.msk.bf16.mxu0 %vm474_vm2, %v4318_v49 }
  0x58   : > { %3905 = vmatprep.subr.msk.bf16.mxu0 %vm534_vm0, %v3280_v36  ;;  %3541 = vmatprep.mubr.msk.bf16.mxu1 %vm474_vm2, %v973_v26  ;;  %v1421_v26 = vld [vmem:[#allocation2 + $0x40] sm:$0xf] }
  0x59   : > { %v1481_v4 = vshll.u32 %v1421_v26, 16 }
  0x5e   : > { %3570 = vmatmul.mubr.msk.bf16.gmra.mrb[4].mxu0 %vm474_vm2, %v4334_v60  ;;  %3542 = vmatmul.mubr.msk.bf16.vlgmr.msra.gmra.mrb[4].mxu1 %vm474_vm2, %v4318_v49 }
  0x5f   : > { %3573 = vmatprep.mubr.msk.bf16.mxu0 %vm474_vm2, %v4339_v63  ;;  %3545 = vmatprep.mubr.msk.bf16.mxu1 %vm474_vm2, %v4334_v60 }
  0x66   : > { %3574 = vmatmul.mubr.msk.bf16.gmra.mrb[8].mxu0 %vm474_vm2, %v1009_v57  ;;  %3546 = vmatmul.mubr.msk.bf16.gmra.mrb[8].mxu1 %vm474_vm2, %v681_v55  ;;  %v4544_v57 = vadd.s32 8, %v4534_v53  ;;  %v4027_v53 = vmov (!%p3322_p7), 0  }
  0x67   : > { %3579 = vmatprep.mubr.msk.bf16.mxu0 %vm474_vm2, %v1136_v9 }
  0x68   : > { %vm1947_vm8 = vcmp.le.s32.totalorder %v4544_v57, 8 }
  0x6e   : > { %3580 = vmatmul.mubr.msk.bf16.vlgmr.msra.gmra.mrb[0].mxu0 %vm474_vm2, %v4360_v16  ;;  %v1296_v16 = vshll.u32 %v1261_v61, 16 }
  0x6f   : > { %3592 = vmatpush3.bf16.msra.mxu0 %v1320_v13  ;;  %3583 = vmatprep.mubr.msk.bf16.mxu0 %vm474_vm2, %v4399_v7 }
  0x70   : > { %3906 = vmatprep.subr.msk.bf16.mxu0 %vm534_vm0, %v3287_v47 }
  0x76   : > { %3584 = vmatmul.mubr.msk.bf16.gmra.mrb[4].mxu0 %vm474_vm2, %v4403_v45 }
  0x77   : > { %3587 = vmatprep.mubr.msk.bf16.mxu0 %vm474_vm2, %v1144_v14 }
  0x7e   : > { %3588 = vmatmul.mubr.msk.bf16.gmra.mrb[8].mxu0 %vm474_vm2, %v1146_v12 }
  0x7f   : > { %3593 = vmatprep.mubr.msk.bf16.mxu0 %vm474_vm2, %v4294_v37  ;;  %v1298_v37 = vrot.slane %v1296_v16, 5 }
  0x81   : > { %v1299_v18 = vor.u32 %v1298_v37, %v1295_v0 }
  0x86   : > { %3594 = vmatmul.mubr.msk.bf16.vlgmr.msra.gmra.mrb[0].mxu0 %vm474_vm2, %v4265_v54  ;;  %v1300_v54 = vsel %vm787_vm4, %v4296_v39, %v1299_v18  ;;  %v1478_v39 = vshrl.u32 %v1421_v26, 16 }
  0x87   : > { %3606 = vmatpush3.bf16.msra.mxu0 %v1505_v22  ;;  %3597 = vmatprep.mubr.msk.bf16.mxu0 %vm474_vm2, %v4286_v19 }
  0x88   : > { %3907 = vmatprep.subr.msk.bf16.mxu0 %vm534_vm0, %v3294_v24  ;;  %v1480_v32 = vrot.slane %v1478_v39, 3 }
  0x8e   : > { %3598 = vmatmul.mubr.msk.bf16.gmra.mrb[4].mxu0 %vm474_vm2, %v4289_v20 }
  0x8f   : > { %3601 = vmatprep.mubr.msk.bf16.mxu0 %vm474_vm2, %v4304_v44 }
  0x96   : > { %3602 = vmatmul.mubr.msk.bf16.gmra.mrb[8].mxu0 %vm474_vm2, %v1300_v54 }
  0x97   : > { %3607 = vmatprep.mubr.msk.bf16.mxu0 %vm474_vm2, %v4315_v48  ;;  %v1483_v48 = vrot.slane %v1481_v4, 4 }
  0x99   : > { %v1484_v33 = vor.u32 %v1483_v48, %v1480_v32 }
  0x9e   : > { %3608 = vmatmul.mubr.msk.bf16.vlgmr.msra.gmra.mrb[0].mxu0 %vm474_vm2, %v4318_v49  ;;  %v1485_v49 = vsel %vm619_vm3, %v4363_v17, %v1484_v33 }
  0x9f   : > { %3620 = vmatpush3.bf16.msra.mxu0 %v1642_v21  ;;  %3611 = vmatprep.mubr.msk.bf16.mxu0 %vm474_vm2, %v4334_v60  ;;  %v1796_v60 = vsel %vm534_vm0, %v3301_v29, 0 }
  0xa0   : > { %3908 = vmatprep.subr.msk.bf16.mxu0 %vm534_vm0, %v3301_v29 }
  0xa6   : > { %3612 = vmatmul.mubr.msk.bf16.gmra.mrb[4].mxu0 %vm474_vm2, %v4339_v63  ;;  %v1621_v63 = vrot.slane %v1421_v26, 4 }
  0xa7   : > { %3615 = vmatprep.mubr.msk.bf16.mxu0 %vm474_vm2, %v4380_v27 }
  0xa8   : > { %v1622_v17 = vsel %vm502_vm5, %v1619_v25, %v1621_v63 }
  0xae   : > { %3616 = vmatmul.mubr.msk.bf16.gmra.mrb[8].mxu0 %vm474_vm2, %v1485_v49 }
  0xaf   : > { %3621 = vmatprep.mubr.msk.bf16.mxu0 %vm474_vm2, %v4372_v23  ;;  %v1737_v23 = vld [vmem:[#allocation2 + $0x40] sm:$0x1f] }
  0xb0   : > { %v1769_v27 = vshrl.u32 %v1737_v23, 16  ;;  %v1772_v62 = vshll.u32 %v1737_v23, 16 }
  0xb2   : > { %v1774_v34 = vrot.slane %v1772_v62, 5 }
  0xb6   : > { %3622 = vmatmul.mubr.msk.bf16.vlgmr.msra.gmra.mrb[0].mxu0 %vm474_vm2, %v4399_v7 }
  0xb7   : > { %3634 = vmatpush3.bf16.msra.mxu0 %v1796_v60  ;;  %3625 = vmatprep.mubr.msk.bf16.mxu0 %vm474_vm2, %v4403_v45 }
  0xbe   : > { %3626 = vmatmul.mubr.msk.bf16.gmra.mrb[4].mxu0 %vm474_vm2, %v1144_v14 }
  0xbf   : > { %3629 = vmatprep.mubr.msk.bf16.mxu0 %vm474_vm2, %v4387_v1  ;;  %v1771_v1 = vrot.slane %v1769_v27, 4 }
  0xc1   : > { %v1775_v30 = vor.u32 %v1774_v34, %v1771_v1 }
  0xc3   : > { %v1776_v25 = vsel %vm787_vm4, %v4407_v46, %v1775_v30  ;;  %v4532_v46 = vld [vmem:[%s4752_s2] ss:$0 sm:$0xff] }
  0xc6   : > { %3630 = vmatmul.mubr.msk.bf16.gmra.mrb[8].mxu0 %vm474_vm2, %v1622_v17 }
  0xc7   : > { %3635 = vmatprep.mubr.msk.bf16.mxu0 %vm474_vm2, %v4413_v31 }
  0xce   : > { %3636 = vmatmul.mubr.msk.bf16.vlgmr.msra.gmra.mrb[0].mxu0 %vm474_vm2, %v4286_v19 }
  0xcf   : > { %3639 = vmatprep.mubr.msk.bf16.mxu0 %vm474_vm2, %v4289_v20 }
  0xd6   : > { %3640 = vmatmul.mubr.msk.bf16.gmra.mrb[4].mxu0 %vm474_vm2, %v4304_v44 }
  0xd7   : > { %3643 = vmatprep.mubr.msk.bf16.mxu0 %vm474_vm2, %v4418_v56 }
  0xde   : > { %3644 = vmatmul.mubr.msk.bf16.gmra.mrb[8].mxu0 %vm474_vm2, %v1776_v25 }
 0x119   : > { %v3525_v19 = vpop.f32.mrb[0].mxu1 }
 0x11a   : > { %v572_v36 = vpop.f32.mrb[1].mxu1 }
 0x11b   : > { %v3526_v40 = vpop.f32.mrb[2].mxu1 }
 0x11c   : > { %v575_v20 = vpop.f32.mrb[3].mxu1 }
 0x131   : > { %v3543_v10 = vpop.f32.mrb[4].mxu1 }
 0x132   : > { %v753_v42 = vpop.f32.mrb[5].mxu1 }
 0x133   : > { %v3544_v43 = vpop.f32.mrb[6].mxu1 }
 0x134   : > { %v756_v6 = vpop.f32.mrb[7].mxu1 }
 0x139   : > { %v4521_v35 = vpop.f32.mrb[8].mxu1 }
 0x13a   : > { %v4523_v44 = vpop.f32.mrb[9].mxu1 }
 0x13b   : > { %v4525_v50 = vpop.f32.mrb[10].mxu1 }
 0x13c   : > { %v4527_v7 = vpop.f32.mrb[11].mxu1 }
 0x1a1   : > { %v3637_v45 = vpop.f32.mrb[0].mxu0 }
 0x1a2   : > { %v3739_v31 = vadd.f32 %v3637_v45, %v3525_v19  ;;  %v1832_v56 = vpop.f32.mrb[1].mxu0 }
 0x1a3   : > { %v3740_v59 = vadd.f32 %v1832_v56, %v572_v36  ;;  %v3638_v3 = vpop.f32.mrb[2].mxu0 }
 0x1a4   : > { %v1900_v5 = vmul.f32 %v3739_v31, %v4532_v46  ;;  %v3741_v41 = vadd.f32 %v3638_v3, %v3526_v40  ;;  %v1835_v38 = vpop.f32.mrb[3].mxu0 }
 0x1a5   : > { %v1898_v8 = vmul.f32 %v3740_v59, %v4532_v46  ;;  %v3742_v9 = vadd.f32 %v1835_v38, %v575_v20 }
 0x1a6   : > { %v1919_v11 = vadd.f32 %v4539_v58, %v1900_v5  ;;  %v1901_v2 = vmul.f32 %v3741_v41, %v4532_v46 }
 0x1a7   : > { %v1917_v52 = vadd.f32 %v4539_v58, %v1898_v8  ;;  %v1899_v13 = vmul.f32 %v3742_v9, %v4532_v46 }
 0x1a8   : > { %v1931_v47 = vmax.f32 %v1919_v11, 0.0  ;;  %v1920_v55 = vadd.f32 %v4539_v58, %v1901_v2 }
 0x1a9   : > { %v1929_v14 = vmax.f32 %v1917_v52, 0.0  ;;  %v1918_v51 = vadd.f32 %v4539_v58, %v1899_v13  ;;  %v3641_v12 = vpop.f32.mrb[4].mxu0 }
 0x1aa   : > { %v1956_v22 = vsel %vm1944_vm7, %v1931_v47, 0.0  ;;  %v1932_v61 = vmax.f32 %v1920_v55, 0.0  ;;  %v3743_v24 = vadd.f32 %v3641_v12, %v3543_v10  ;;  %v1848_v15 = vpop.f32.mrb[5].mxu0 }
 0x1ab   : > { %v3403_v16 = vpack.c.bf16 %v1956_v22, %v1956_v22  ;;  %v1954_v0 = vsel %vm1944_vm7, %v1929_v14, 0.0  ;;  %v1930_v37 = vmax.f32 %v1918_v51, 0.0  ;;  %v3744_v18 = vadd.f32 %v1848_v15, %v753_v42  ;;  %v3642_v54 = vpop.f32.mrb[6].mxu0 }
 0x1ac   : > { %v3401_v21 = vpack.c.bf16 %v1954_v0, %v1954_v0  ;;  %v1957_v26 = vsel %vm1947_vm8, %v1932_v61, 0.0  ;;  %v1904_v29 = vmul.f32 %v3743_v24, %v4532_v46  ;;  %v3745_v39 = vadd.f32 %v3642_v54, %v3544_v43  ;;  %v1851_v4 = vpop.f32.mrb[7].mxu0 }
 0x1ad   : > { %2017 = vst.msk [vmem:[#allocation3 + $0x8] sm:$0xf] %vm2014_vm9, %v3403_v16  ;;  %v3404_v32 = vpack.c.bf16 %v1957_v26, %v1957_v26  ;;  %v1955_v48 = vsel %vm1947_vm8, %v1930_v37, 0.0  ;;  %v1902_v33 = vmul.f32 %v3744_v18, %v4532_v46  ;;  %v3746_v49 = vadd.f32 %v1851_v4, %v756_v6 }
 0x1ae   : > { %2015 = vst.msk [vmem:[#allocation3] sm:$0xf] %vm2014_vm9, %v3401_v21  ;;  %v3402_v60 = vpack.c.bf16 %v1955_v48, %v1955_v48  ;;  %v1923_v63 = vadd.f32 %v4539_v58, %v1904_v29  ;;  %v1905_v17 = vmul.f32 %v3745_v39, %v4532_v46 }
 0x1af   : > { %2018 = vst.msk [vmem:[#allocation3 + $0xc] sm:$0xf] %vm2014_vm9, %v3404_v32  ;;  %v1921_v23 = vadd.f32 %v4539_v58, %v1902_v33  ;;  %v1903_v27 = vmul.f32 %v3746_v49, %v4532_v46  ;;  %2031 = vst.msk [vmem:[#allocation3] sm:$0xf] (!%p3322_p7), %vm2014_vm9, %v4027_v53 }
 0x1b0   : > { %2016 = vst.msk [vmem:[#allocation3 + $0x4] sm:$0xf] %vm2014_vm9, %v3402_v60  ;;  %v1935_v62 = vmax.f32 %v1923_v63, 0.0  ;;  %v1924_v1 = vadd.f32 %v4539_v58, %v1905_v17 }
 0x1b1   : > { %v1933_v34 = vmax.f32 %v1921_v23, 0.0  ;;  %v1922_v30 = vadd.f32 %v4539_v58, %v1903_v27  ;;  %v3645_v25 = vpop.f32.mrb[8].mxu0  ;;  %2032 = vst.msk [vmem:[#allocation3 + $0x4] sm:$0xf] (!%p3322_p7), %vm2014_vm9, %v4027_v53 }
 0x1b2   : > { %v1960_v19 = vsel %vm1944_vm7, %v1935_v62, 0.0  ;;  %v1936_v36 = vmax.f32 %v1924_v1, 0.0  ;;  %v3747_v40 = vadd.f32 %v3645_v25, %v4521_v35  ;;  %v1864_v20 = vpop.f32.mrb[9].mxu0 }
 0x1b3   : > { %v3407_v10 = vpack.c.bf16 %v1960_v19, %v1960_v19  ;;  %v1958_v42 = vsel %vm1944_vm7, %v1933_v34, 0.0  ;;  %v1934_v43 = vmax.f32 %v1922_v30, 0.0  ;;  %v3748_v6 = vadd.f32 %v1864_v20, %v4523_v44  ;;  %v3646_v28 = vpop.f32.mrb[10].mxu0 }
 0x1b4   : > { %v3405_v45 = vpack.c.bf16 %v1958_v42, %v1958_v42  ;;  %v1961_v31 = vsel %vm1947_vm8, %v1936_v36, 0.0  ;;  %v1908_v56 = vmul.f32 %v3747_v40, %v4532_v46  ;;  %v3749_v59 = vadd.f32 %v3646_v28, %v4525_v50  ;;  %v1867_v3 = vpop.f32.mrb[11].mxu0 }
 0x1b5   : > { %2021 = vst.msk [vmem:[#allocation3 + $0x18] sm:$0xf] %vm2014_vm9, %v3407_v10  ;;  %v3408_v35 = vpack.c.bf16 %v1961_v31, %v1961_v31  ;;  %v1959_v5 = vsel %vm1947_vm8, %v1934_v43, 0.0  ;;  %v1906_v41 = vmul.f32 %v3748_v6, %v4532_v46  ;;  %v3750_v44 = vadd.f32 %v1867_v3, %v4527_v7 }
 0x1b6   : > { %2019 = vst.msk [vmem:[#allocation3 + $0x10] sm:$0xf] %vm2014_vm9, %v3405_v45  ;;  %v3406_v38 = vpack.c.bf16 %v1959_v5, %v1959_v5  ;;  %v1927_v8 = vadd.f32 %v4539_v58, %v1908_v56  ;;  %v1909_v9 = vmul.f32 %v3749_v59, %v4532_v46 }
 0x1b7   : > { %2022 = vst.msk [vmem:[#allocation3 + $0x1c] sm:$0xf] %vm2014_vm9, %v3408_v35  ;;  %v1925_v50 = vadd.f32 %v4539_v58, %v1906_v41  ;;  %v1907_v11 = vmul.f32 %v3750_v44, %v4532_v46 }
 0x1b8   : > { %2020 = vst.msk [vmem:[#allocation3 + $0x14] sm:$0xf] %vm2014_vm9, %v3406_v38  ;;  %v1939_v2 = vmax.f32 %v1927_v8, 0.0  ;;  %v1928_v52 = vadd.f32 %v4539_v58, %v1909_v9 }
 0x1b9   : > { %v1937_v13 = vmax.f32 %v1925_v50, 0.0  ;;  %v1926_v7 = vadd.f32 %v4539_v58, %v1907_v11 }
 0x1ba   : > { %v1964_v47 = vsel %vm1944_vm7, %v1939_v2, 0.0  ;;  %v1940_v55 = vmax.f32 %v1928_v52, 0.0  ;;  %2030 = sbr.rel (%p3322_p7) target bundleno = 449 (0x1c1), region = 52 }
 0x1bb   : > { %v3411_v14 = vpack.c.bf16 %v1964_v47, %v1964_v47  ;;  %v1962_v51 = vsel %vm1944_vm7, %v1937_v13, 0.0  ;;  %v1938_v12 = vmax.f32 %v1926_v7, 0.0 }
 0x1bc   : > { %v3409_v22 = vpack.c.bf16 %v1962_v51, %v1962_v51  ;;  %v1965_v46 = vsel %vm1947_vm8, %v1940_v55, 0.0 }
 0x1bd   : > { %2025 = vst.msk [vmem:[#allocation3 + $0x28] sm:$0xf] %vm2014_vm9, %v3411_v14  ;;  %v3412_v61 = vpack.c.bf16 %v1965_v46, %v1965_v46  ;;  %v1963_v24 = vsel %vm1947_vm8, %v1938_v12, 0.0 }
 0x1be   : > { %2023 = vst.msk [vmem:[#allocation3 + $0x20] sm:$0xf] %vm2014_vm9, %v3409_v22  ;;  %v3410_v58 = vpack.c.bf16 %v1963_v24, %v1963_v24 }
 0x1bf   : > { %2026 = vst.msk [vmem:[#allocation3 + $0x2c] sm:$0xf] %vm2014_vm9, %v3412_v61 }
 0x1c0   : > { %2024 = vst.msk [vmem:[#allocation3 + $0x24] sm:$0xf] %vm2014_vm9, %v3410_v58 }
 0x1c1 PF: > { %p3323_p8 = scmp.ne.s32.totalorder %s4009_s24, 1 }
 0x1c2   : > { %v4028_v57 = vmov (!%p3323_p8), 0  }
 0x1c3   : > { %2036 = sbr.rel (%p3323_p8) target bundleno = 458 (0x1ca), region = 56  ;;  %2037 = vst.msk [vmem:[#allocation3 + $0x28] sm:$0xf] (!%p3323_p8), %vm2014_vm9, %v4028_v57  ;;  %2038 = vst.msk [vmem:[#allocation3 + $0x2c] sm:$0xf] (!%p3323_p8), %vm2014_vm9, %v4028_v57 }
 0x1ca PF: > { %v3324_v15 = vld [vmem:[%s4754_s4 + $0x4] sm:$0xf]  ;;  %v2039_v16 = vld [vmem:[#allocation3] sm:$0xf]  ;;  %v2040_v0 = vld [vmem:[#allocation3 + $0x4] sm:$0xf] }
 0x1cb   : > { %3909 = vmatprep.subr.msk.bf16.mxu1 %vm502_vm5, %v3324_v15  ;;  %v2126_v37 = vsel %vm502_vm5, %v3324_v15, 0  ;;  %v3325_v18 = vcombine.low %v2039_v16, %v2040_v0  ;;  %v3962_v54 = vld [vmem:[#allocation3 + $0x8] sm:$0xff]   ;;  %vm2074_vm10 = vsmask.f32 7424  ;;  %v2047_v21 = vld [vmem:[%s4754_s4] sm:$0xf] }
 0x1cc   : > { %3648 = vmatpush3.bf16.msra.mxu1 %v2126_v37  ;;  %v3963_v26 = vld [vmem:[#allocation3 + $0x10] sm:$0xff]   ;;  %v2083_v4 = vshll.u32 %v3962_v54, 16  ;;  %v2087_v32 = vshrl.u32 %v3962_v54, 16  ;;  %v3964_v60 = vld [vmem:[#allocation3 + $0x18] sm:$0xff]   ;;  %vm2111_vm11 = vcmask 64512   ;;  %v2198_v36 = vsel %vm502_vm5, %v2047_v21, 0 }
 0x1cd   : > { %v2076_v29 = vshrl.u32 %v3325_v18, 16  ;;  %v2078_v39 = vshll.u32 %v3325_v18, 16  ;;  %3910 = vmatprep.subr.msk.bf16.mxu1 %vm502_vm5, %v2047_v21  ;;  %v2091_v48 = vshll.u32 %v3963_v26, 16  ;;  %v2095_v63 = vshrl.u32 %v3963_v26, 16  ;;  %v3338_v10 = vld [vmem:[%s4754_s4 + $0x8] sm:$0xf] }
 0x1ce   : > { %v2085_v49 = vrot.slane %v2083_v4, 1  ;;  %v3965_v23 = vld [vmem:[#allocation3 + $0x20] ss:$0 sps:$4 sm:$0x11]   ;;  %v2099_v1 = vshll.u32 %v3964_v60, 16  ;;  %v2103_v30 = vshrl.u32 %v3964_v60, 16 }
 0x1cf   : > { %v2080_v33 = vrot.slane %v2078_v39, 1  ;;  %v2093_v17 = vrot.slane %v2091_v48, 1  ;;  %v2107_v25 = vshll.u32 %v3965_v23, 16  ;;  %v2261_v45 = vld [vmem:[#allocation3] sm:$0xe]  ;;  %v2290_v31 = vsel %vm502_vm5, %v3338_v10, 0 }
 0x1d0   : > { %v2089_v62 = vor.u32 %v2087_v32, %v2085_v49  ;;  %v2101_v20 = vrot.slane %v2099_v1, 1  ;;  %v3339_v56 = vcombine.low %v2261_v45, %v2040_v0  ;;  %v3344_v59 = vld [vmem:[%s4754_s4 + $0xc] sm:$0xf]  ;;  %v2269_v35 = vrot.slane %v3962_v54, 1  ;;  %v3353_v50 = vld [vmem:[%s4754_s4 + $0x10] sm:$0xf] }
 0x1d1   : > { %v2081_v27 = vor.u32 %v2080_v33, %v2076_v29  ;;  %v2097_v34 = vor.u32 %v2095_v63, %v2093_v17  ;;  %v2109_v6 = vrot.slane %v2107_v25, 1  ;;  %vm2267_vm12 = vcmask 1046528   ;;  %v2467_v2 = vld [vmem:[#allocation3 + $0x8] sm:$0xf]  ;;  %v2468_v52 = vld [vmem:[#allocation3 + $0xc] sm:$0xf] }
 0x1d2   : > { %v2094_v40 = vsel %vm2074_vm10, %v2089_v62, %v2093_v17  ;;  %v2105_v43 = vor.u32 %v2103_v30, %v2101_v20  ;;  %v2268_v3 = vrot.slane %v3339_v56, 1  ;;  %v2271_v41 = vrot.slane %v3963_v26, 1  ;;  %v3967_v7 = vld [vmem:[#allocation3 + $0x8] sm:$0xff]   ;;  %v3972_v55 = vld [vmem:[#allocation3 + $0x10] sm:$0xff]   ;;  %v3969_v12 = vld [vmem:[#allocation3 + $0x18] sm:$0xff]  }
 0x1d3   : > { %v2086_v19 = vsel %vm2074_vm10, %v2081_v27, %v2085_v49  ;;  %v2102_v42 = vsel %vm2074_vm10, %v2097_v34, %v2101_v20  ;;  %v2273_v44 = vrot.slane %v3964_v60, 1  ;;  %v2400_v8 = vsel %vm502_vm5, %v3344_v59, 0  ;;  %v3968_v51 = vld [vmem:[#allocation3 + $0x10] sm:$0xff]   ;;  %v3363_v58 = vld [vmem:[%s4754_s4 + $0x14] sm:$0xf]  ;;  %v3973_v53 = vld [vmem:[#allocation3 + $0x18] sm:$0xff]  }
 0x1d4   : > { %3649 = vmatprep.mubr.msk.bf16.mxu1 %vm2111_vm11, %v2086_v19  ;;  %v2110_v28 = vsel %vm2074_vm10, %v2105_v43, %v2109_v6  ;;  %v2270_v5 = vsel %vm2267_vm12, %v2268_v3, %v2269_v35  ;;  %v2272_v38 = vsel %vm2267_vm12, %v2269_v35, %v2271_v41  ;;  %v2275_v11 = vrot.slane %v3965_v23, 1  ;;  %v3974_v16 = vld [vmem:[#allocation3 + $0x20] sm:$0xff]   ;;  %v3975_v4 = vld [vmem:[#allocation3 + $0x28] ss:$0 sps:$4 sm:$0x11]   ;;  %v3982_v35 = vld [vmem:[#allocation3 + $0x18] sm:$0xff]  }
 0x1d5   : > { %3650 = vmatmul.mubr.msk.bf16.vlgmr.msra.gmra.mrb[12].mxu1 %vm2111_vm11, %v2094_v40  ;;  %v2274_v9 = vsel %vm2267_vm12, %v2271_v41, %v2273_v44  ;;  %v3354_v47 = vcombine.low %v2467_v2, %v2468_v52  ;;  %v2550_v22 = vsel %vm502_vm5, %v3353_v50, 0  ;;  %v2509_v24 = vshll.u32 %v3972_v55, 16  ;;  %v3970_v0 = vld [vmem:[#allocation3 + $0x20] sm:$0xff]   ;;  %v2617_v33 = vld [vmem:[#allocation3 + $0x8] sm:$0xe]  ;;  %v3978_v41 = vld [vmem:[#allocation3 + $0x18] sm:$0xff]  }
 0x1d6   : > { %3658 = vmatpush3.bf16.msra.mxu1 %v2198_v36  ;;  %3653 = vmatprep.mubr.msk.bf16.mxu1 %vm2111_vm11, %v2102_v42  ;;  %v2276_v13 = vsel %vm2267_vm12, %v2273_v44, %v2275_v11  ;;  %v2517_v37 = vshll.u32 %v3973_v53, 16  ;;  %v2521_v21 = vshrl.u32 %v3973_v53, 16  ;;  %v2533_v63 = vshll.u32 %v3975_v4, 16  ;;  %v3369_v62 = vld [vmem:[%s4754_s4 + $0x18] sm:$0xf]  ;;  %v3979_v44 = vld [vmem:[#allocation3 + $0x20] sm:$0xff]  }
 0x1d7   : > { %3911 = vmatprep.subr.msk.bf16.mxu1 %vm502_vm5, %v3338_v10  ;;  %v2504_v14 = vshll.u32 %v3354_v47, 16  ;;  %v2502_v46 = vshrl.u32 %v3354_v47, 16  ;;  %v2511_v15 = vrot.slane %v2509_v24, 1  ;;  %v2645_v17 = vsel %vm502_vm5, %v3363_v58, 0  ;;  %v3378_v6 = vld [vmem:[%s4754_s4 + $0x1c] sm:$0xf] }
 0x1d8   : > { %v2519_v29 = vrot.slane %v2517_v37, 1  ;;  %v3364_v27 = vcombine.low %v2617_v33, %v2468_v52  ;;  %v2535_v34 = vrot.slane %v2533_v63, 1  ;;  %v2624_v25 = vrot.slane %v3972_v55, 1  ;;  %v2822_v45 = vld [vmem:[#allocation3 + $0x10] sm:$0xf]  ;;  %v3983_v2 = vld [vmem:[#allocation3 + $0x20] sm:$0xff]  }
 0x1d9   : > { %v2506_v61 = vrot.slane %v2504_v14, 1  ;;  %v2626_v40 = vrot.slane %v3973_v53, 1  ;;  %v2628_v20 = vrot.slane %v3974_v16, 1  ;;  %v2755_v42 = vsel %vm502_vm5, %v3369_v62, 0  ;;  %v3388_v11 = vld [vmem:[%s4754_s4 + $0x20] sm:$0xf] }
 0x1da   : > { %v2523_v32 = vor.u32 %v2521_v21, %v2519_v29  ;;  %v2623_v30 = vrot.slane %v3364_v27, 1  ;;  %v3980_v47 = vld [vmem:[#allocation3 + $0x28] sm:$0xff]   ;;  %v2868_v14 = vshrl.u32 %v3982_v35, 16  ;;  %v3985_v24 = vld [vmem:[#allocation3 + $0x30] ss:$0 sps:$4 sm:$0x11]  }
 0x1db   : > { %v2507_v57 = vor.u32 %v2506_v61, %v2502_v46  ;;  %v2627_v10 = vsel %vm2267_vm12, %v2624_v25, %v2626_v40  ;;  %v2629_v43 = vsel %vm2267_vm12, %v2626_v40, %v2628_v20  ;;  %v3000_v37 = vsel %vm502_vm5, %v3388_v11, 0 }
 0x1dc   : > { %v2625_v36 = vsel %vm2267_vm12, %v2623_v30, %v2624_v25  ;;  %v2985_v63 = vrot.slane %v3985_v24, 1 }
 0x1dd   : > { %3654 = vmatmul.mubr.msk.bf16.gmra.mrb[16].mxu1 %vm2111_vm11, %v2110_v28  ;;  %v2630_v28 = vrot.slane %v3975_v4, 1 }
 0x1de   : > { %3659 = vmatprep.mubr.msk.bf16.mxu1 %vm2111_vm11, %v3325_v18  ;;  %v2513_v18 = vshrl.u32 %v3972_v55, 16  ;;  %v2872_v55 = vshll.u32 %v3983_v2, 16 }
 0x1df   : > { %v2631_v56 = vsel %vm2267_vm12, %v2628_v20, %v2630_v28 }
 0x1e0   : > { %v2515_v39 = vor.u32 %v2513_v18, %v2511_v15  ;;  %v2874_v46 = vrot.slane %v2872_v55, 1 }
 0x1e2   : > { %v2520_v49 = vsel %vm2074_vm10, %v2515_v39, %v2519_v29  ;;  %v2979_v39 = vrot.slane %v3982_v35, 1 }
 0x1e5   : > { %3660 = vmatmul.mubr.msk.bf16.vlgmr.msra.gmra.mrb[12].mxu1 %vm2111_vm11, %v3962_v54  ;;  %v2512_v54 = vsel %vm2074_vm10, %v2507_v57, %v2511_v15  ;;  %v2972_v57 = vld [vmem:[#allocation3 + $0x10] sm:$0xe] }
 0x1e6   : > { %3668 = vmatpush3.bf16.msra.mxu1 %v2290_v31  ;;  %3663 = vmatprep.mubr.msk.bf16.mxu1 %vm2111_vm11, %v3963_v26  ;;  %v2525_v26 = vshll.u32 %v3974_v16, 16  ;;  %v2823_v31 = vld [vmem:[#allocation3 + $0x14] sm:$0xf] }
 0x1e7   : > { %3912 = vmatprep.subr.msk.bf16.mxu1 %vm502_vm5, %v3344_v59  ;;  %v3977_v59 = vld [vmem:[#allocation3 + $0x10] sm:$0xff]   ;;  %v3379_v3 = vcombine.low %v2822_v45, %v2823_v31 }
 0x1e8   : > { %v2527_v48 = vrot.slane %v2525_v26, 1 }
 0x1ea   : > { %v2528_v23 = vsel %vm2074_vm10, %v2523_v32, %v2527_v48 }
 0x1ed   : > { %3664 = vmatmul.mubr.msk.bf16.gmra.mrb[16].mxu1 %vm2111_vm11, %v3964_v60  ;;  %v2529_v60 = vshrl.u32 %v3974_v16, 16 }
 0x1ee   : > { %3669 = vmatprep.mubr.msk.bf16.mxu1 %vm2111_vm11, %v2270_v5  ;;  %v2859_v5 = vshll.u32 %v3379_v3, 16 }
 0x1ef   : > { %v2531_v1 = vor.u32 %v2529_v60, %v2527_v48  ;;  %v2981_v48 = vrot.slane %v3983_v2, 1 }
 0x1f1   : > { %v2536_v19 = vsel %vm2074_vm10, %v2531_v1, %v2535_v34 }
 0x1f5   : > { %3670 = vmatmul.mubr.msk.bf16.vlgmr.msra.gmra.mrb[12].mxu1 %vm2111_vm11, %v2272_v38  ;;  %v2905_v38 = vsel %vm502_vm5, %v3378_v6, 0 }
 0x1f6   : > { %3678 = vmatpush3.bf16.msra.mxu1 %v2400_v8  ;;  %3673 = vmatprep.mubr.msk.bf16.mxu1 %vm2111_vm11, %v2274_v9  ;;  %v2857_v8 = vshrl.u32 %v3379_v3, 16  ;;  %v2861_v9 = vrot.slane %v2859_v5, 1 }
 0x1f7   : > { %3913 = vmatprep.subr.msk.bf16.mxu1 %vm502_vm5, %v3353_v50  ;;  %v2864_v50 = vshll.u32 %v3982_v35, 16 }
 0x1f8   : > { %v2862_v52 = vor.u32 %v2861_v9, %v2857_v8 }
 0x1fd   : > { %3674 = vmatmul.mubr.msk.bf16.gmra.mrb[16].mxu1 %vm2111_vm11, %v2276_v13  ;;  %v2866_v13 = vrot.slane %v2864_v50, 1 }
 0x1fe   : > { %3679 = vmatprep.mubr.msk.bf16.mxu1 %vm2111_vm11, %v3967_v7  ;;  %v3984_v7 = vld [vmem:[#allocation3 + $0x28] sm:$0xff]  }
 0x1ff   : > { %v2870_v61 = vor.u32 %v2868_v14, %v2866_v13  ;;  %v2884_v16 = vshrl.u32 %v3984_v7, 16  ;;  %v2983_v33 = vrot.slane %v3984_v7, 1 }
 0x201   : > { %v2875_v15 = vsel %vm2074_vm10, %v2870_v61, %v2874_v46  ;;  %v2984_v60 = vsel %vm2267_vm12, %v2981_v48, %v2983_v33 }
 0x205   : > { %3680 = vmatmul.mubr.msk.bf16.vlgmr.msra.gmra.mrb[12].mxu1 %vm2111_vm11, %v3968_v51  ;;  %v2867_v51 = vsel %vm2074_vm10, %v2862_v52, %v2866_v13 }
 0x206   : > { %3688 = vmatpush3.bf16.msra.mxu1 %v2550_v22  ;;  %3683 = vmatprep.mubr.msk.bf16.mxu1 %vm2111_vm11, %v3969_v12  ;;  %v2876_v12 = vshrl.u32 %v3983_v2, 16  ;;  %v2880_v22 = vshll.u32 %v3984_v7, 16 }
 0x207   : > { %3914 = vmatprep.subr.msk.bf16.mxu1 %vm502_vm5, %v3363_v58 }
 0x208   : > { %v2878_v58 = vor.u32 %v2876_v12, %v2874_v46  ;;  %v2882_v53 = vrot.slane %v2880_v22, 1 }
 0x20a   : > { %v2883_v18 = vsel %vm2074_vm10, %v2878_v58, %v2882_v53  ;;  %v2886_v21 = vor.u32 %v2884_v16, %v2882_v53 }
 0x20d   : > { %3684 = vmatmul.mubr.msk.bf16.gmra.mrb[16].mxu1 %vm2111_vm11, %v3970_v0  ;;  %v2888_v0 = vshll.u32 %v3985_v24, 16 }
 0x20e   : > { %3689 = vmatprep.mubr.msk.bf16.mxu1 %vm2111_vm11, %v2512_v54  ;;  %v3389_v54 = vcombine.low %v2972_v57, %v2823_v31 }
 0x20f   : > { %v2890_v26 = vrot.slane %v2888_v0, 1 }
 0x210   : > { %v2978_v29 = vrot.slane %v3389_v54, 1 }
 0x211   : > { %v2891_v4 = vsel %vm2074_vm10, %v2886_v21, %v2890_v26 }
 0x212   : > { %v2980_v32 = vsel %vm2267_vm12, %v2978_v29, %v2979_v39 }
 0x215   : > { %3690 = vmatmul.mubr.msk.bf16.vlgmr.msra.gmra.mrb[12].mxu1 %vm2111_vm11, %v2520_v49  ;;  %v2982_v49 = vsel %vm2267_vm12, %v2979_v39, %v2981_v48 }
 0x216   : > { %3698 = vmatpush3.bf16.msra.mxu1 %v2645_v17  ;;  %3693 = vmatprep.mubr.msk.bf16.mxu1 %vm2111_vm11, %v2528_v23  ;;  %v2986_v17 = vsel %vm2267_vm12, %v2983_v33, %v2985_v63  ;;  %v3394_v23 = vld [vmem:[%s4755_s5] ss:$0 sm:$0xff] }
 0x217   : > { %3915 = vmatprep.subr.msk.bf16.mxu1 %vm502_vm5, %v3369_v62  ;;  %v3395_v62 = vld [vmem:[%s4756_s6] ss:$0 sm:$0xff] }
 0x21d   : > { %3694 = vmatmul.mubr.msk.bf16.gmra.mrb[16].mxu1 %vm2111_vm11, %v2536_v19 }
 0x21e   : > { %3699 = vmatprep.mubr.msk.bf16.mxu1 %vm2111_vm11, %v2625_v36 }
 0x225   : > { %3700 = vmatmul.mubr.msk.bf16.vlgmr.msra.gmra.mrb[12].mxu1 %vm2111_vm11, %v2627_v10 }
 0x226   : > { %3708 = vmatpush3.bf16.msra.mxu1 %v2755_v42  ;;  %3703 = vmatprep.mubr.msk.bf16.mxu1 %vm2111_vm11, %v2629_v43 }
 0x227   : > { %3916 = vmatprep.subr.msk.bf16.mxu1 %vm502_vm5, %v3378_v6 }
 0x22d   : > { %3704 = vmatmul.mubr.msk.bf16.gmra.mrb[16].mxu1 %vm2111_vm11, %v2631_v56 }
 0x22e   : > { %3709 = vmatprep.mubr.msk.bf16.mxu1 %vm2111_vm11, %v3977_v59 }
 0x235   : > { %3710 = vmatmul.mubr.msk.bf16.vlgmr.msra.gmra.mrb[12].mxu1 %vm2111_vm11, %v3978_v41 }
 0x236   : > { %3718 = vmatpush3.bf16.msra.mxu1 %v2905_v38  ;;  %3713 = vmatprep.mubr.msk.bf16.mxu1 %vm2111_vm11, %v3979_v44 }
 0x237   : > { %3917 = vmatprep.subr.msk.bf16.mxu1 %vm502_vm5, %v3388_v11 }
 0x23d   : > { %3714 = vmatmul.mubr.msk.bf16.gmra.mrb[16].mxu1 %vm2111_vm11, %v3980_v47 }
 0x23e   : > { %3719 = vmatprep.mubr.msk.bf16.mxu1 %vm2111_vm11, %v2867_v51 }
 0x245   : > { %3720 = vmatmul.mubr.msk.bf16.vlgmr.msra.gmra.mrb[12].mxu1 %vm2111_vm11, %v2875_v15 }
 0x246   : > { %3728 = vmatpush3.bf16.msra.mxu1 %v3000_v37  ;;  %3723 = vmatprep.mubr.msk.bf16.mxu1 %vm2111_vm11, %v2883_v18 }
 0x24d   : > { %3724 = vmatmul.mubr.msk.bf16.gmra.mrb[16].mxu1 %vm2111_vm11, %v2891_v4 }
 0x24e   : > { %3729 = vmatprep.mubr.msk.bf16.mxu1 %vm2111_vm11, %v2980_v32 }
 0x255   : > { %3730 = vmatmul.mubr.msk.bf16.vlgmr.msra.gmra.mrb[12].mxu1 %vm2111_vm11, %v2982_v49 }
 0x256   : > { %3733 = vmatprep.mubr.msk.bf16.mxu1 %vm2111_vm11, %v2984_v60 }
 0x25d   : > { %3734 = vmatmul.mubr.msk.bf16.gmra.mrb[16].mxu1 %vm2111_vm11, %v2986_v17 }
 0x328   : > { %v3731_v27 = vpop.f32.mrb[12].mxu1 }
 0x329   : > { %v3075_v1 = vmul.f32 %v3731_v27, %v3394_v23  ;;  %v3036_v34 = vpop.f32.mrb[13].mxu1 }
 0x32a   : > { %v3074_v30 = vmul.f32 %v3394_v23, %v3036_v34  ;;  %v3732_v25 = vpop.f32.mrb[14].mxu1 }
 0x32b   : > { %v3086_v19 = vadd.f32 %v3395_v62, %v3075_v1  ;;  %v3039_v36 = vpop.f32.mrb[15].mxu1 }
 0x32c   : > { %v3085_v40 = vadd.f32 %v3395_v62, %v3074_v30 }
 0x32d   : > { %v3090_v20 = vmax.f32 %v3086_v19, 0.0 }
 0x32e   : > { %v3089_v10 = vmax.f32 %v3085_v40, 0.0 }
 0x32f   : > { %v3094_v42 = vpack.c.bf16 %v3090_v20, %v3090_v20 }
 0x330   : > { %v3093_v43 = vpack.c.bf16 %v3089_v10, %v3089_v10  ;;  %v3735_v6 = vpop.f32.mrb[16].mxu1 }
 0x331   : > { %3098 = vst.msk [vmem:[%s4128_s23 + $0x4] sm:$0xf] %vm2014_vm9, %v3094_v42  ;;  %v3077_v28 = vmul.f32 %v3735_v6, %v3394_v23  ;;  %v3050_v45 = vpop.f32.mrb[17].mxu1 }
 0x332   : > { %3097 = vst.msk [vmem:[%s4128_s23] sm:$0xf] %vm2014_vm9, %v3093_v43  ;;  %v3076_v31 = vmul.f32 %v3394_v23, %v3050_v45  ;;  %v3736_v56 = vpop.f32.mrb[18].mxu1 }
 0x333   : > { %v3088_v59 = vadd.f32 %v3395_v62, %v3077_v28  ;;  %v3053_v3 = vpop.f32.mrb[19].mxu1 }
 0x334   : > { %v3087_v35 = vadd.f32 %v3395_v62, %v3076_v31 }
 0x335   : > { %v3092_v5 = vmax.f32 %v3088_v59, 0.0 }
 0x336   : > { %v3091_v41 = vmax.f32 %v3087_v35, 0.0 }
 0x337   : > { %v3096_v44 = vpack.c.bf16 %v3092_v5, %v3092_v5 }
 0x338   : > { %v3095_v38 = vpack.c.bf16 %v3091_v41, %v3091_v41 }
 0x339   : > { %3100 = vst.msk [vmem:[%s4128_s23 + $0xc] sm:$0xf] %vm2014_vm9, %v3096_v44 }
 0x33a   : > { %3099 = vst.msk [vmem:[%s4128_s23 + $0x8] sm:$0xf] %vm2014_vm9, %v3095_v38 }
 0x33b PF: > { %s17_s28 = sadd.s32 1, %s4025_s28   ;;  %s4758_s24 = smov %s4017_s26 }
 0x33c   : > { %p14_p9 = scmp.ge.s32.totalorder %s17_s28, 6   ;;  %s4759_s25 = smov %s4021_s27 }
 0x33d   : > { %s4760_s26 = smov %s4763_s29  ;;  %s4761_s27 = smov %s4767_s30 }
 0x33e   :  { %16 = sbr.rel (!%p14_p9) target bundleno = 3 (0x3), region = 104 }

</bundles_post_ra>
